<compile_context>
chip_gen: v7x
topology: tpu7x:2x2x1
jax: 0.10.0
libtpu: 0.0.40
codegen_flags: <defaults>
</compile_context>

<pallas_src>
import functools

import jax
import jax.numpy as jnp
from jax.experimental import pallas as pl
from jax.experimental.pallas import tpu as pltpu


# ----------------------------------------------------------------------------
# Parameter construction (mimics torch.nn.LSTM default init:
# uniform(-1/sqrt(hidden), 1/sqrt(hidden)) for all weights and biases).
# Weights are pre-split so the kernel never concatenates along lanes:
#   layer 0 : gates = q @ W_q + r @ W_r + h0 @ W_h + b      (q_star = [q, r])
#   layer l : gates = x @ W_x + h_l @ W_h + b
# which is algebraically identical to [x|h] @ [W_ih^T ; W_hh^T] + b_ih + b_hh.
# ----------------------------------------------------------------------------
def init_lstm_params(key, input_dim, n_layers):
    D = input_dim
    stdv = 1.0 / jnp.sqrt(jnp.float32(D))
    params = []
    for layer in range(n_layers):
        in_dim = 2 * D if layer == 0 else D
        key, k1, k2, k3, k4 = jax.random.split(key, 5)
        w_ih = jax.random.uniform(k1, (4 * D, in_dim), jnp.float32, -stdv, stdv)
        w_hh = jax.random.uniform(k2, (4 * D, D), jnp.float32, -stdv, stdv)
        b_ih = jax.random.uniform(k3, (4 * D,), jnp.float32, -stdv, stdv)
        b_hh = jax.random.uniform(k4, (4 * D,), jnp.float32, -stdv, stdv)
        bias = (b_ih + b_hh).reshape(1, 4 * D)                 # [1, 4D]
        w_x = w_ih.T                                           # [in_dim, 4D]
        w_h = w_hh.T                                           # [D, 4D]
        if layer == 0:
            params.append((w_x[:D], w_x[D:], w_h, bias))       # W_q, W_r, W_h, b
        else:
            params.append((w_x, w_h, bias))                    # W_x, W_h, b
    return params


# ----------------------------------------------------------------------------
# Pallas kernel: whole Set2Set forward for one batch tile.
# ----------------------------------------------------------------------------
def _set2set_kernel(n_iters, n_layers, D, *refs):
    feat_ref = refs[0]                            # [Bt, N, D]
    idx = 1
    layer_refs = []
    for l in range(n_layers):
        nw = 4 if l == 0 else 3
        layer_refs.append(refs[idx:idx + nw])
        idx += nw
    out_ref = refs[idx]                           # [Bt, out_pad]
    h_scr = refs[idx + 1]                         # [n_layers, Bt, D]
    c_scr = refs[idx + 2]                         # [n_layers, Bt, D]
    r_scr = refs[idx + 3]                         # [Bt, D] (readout)

    Bt = out_ref.shape[0]
    out_pad = out_ref.shape[1]

    # Per-tile recurrent state lives in VMEM scratch -> bounded live ranges
    # even though the n_iters / n_layers loops are unrolled at trace time.
    h_scr[...] = jnp.zeros_like(h_scr)
    c_scr[...] = jnp.zeros_like(c_scr)
    r_scr[...] = jnp.zeros_like(r_scr)

    for _ in range(n_iters):
        # ---- fused multi-layer LSTM step (seq_len == 1), split weights ----
        x = None
        for l in range(n_layers):
            h_prev = h_scr[l]                      # [Bt, D]
            c_prev = c_scr[l]                      # [Bt, D]
            if l == 0:
                wq_ref, wr_ref, wh_ref, b_ref = layer_refs[0]
                q_prev = h_scr[n_layers - 1]       # q-part of q_star (prev iter)
                gates = (jnp.dot(q_prev, wq_ref[...],
                                 preferred_element_type=jnp.float32)
                         + jnp.dot(r_scr[...], wr_ref[...],
                                   preferred_element_type=jnp.float32)
                         + jnp.dot(h_prev, wh_ref[...],
                                   preferred_element_type=jnp.float32)
                         + b_ref[...])
            else:
                wx_ref, wh_ref, b_ref = layer_refs[l]
                gates = (jnp.dot(x, wx_ref[...],
                                 preferred_element_type=jnp.float32)
                         + jnp.dot(h_prev, wh_ref[...],
                                   preferred_element_type=jnp.float32)
                         + b_ref[...])
            i_g = jax.nn.sigmoid(gates[:, 0 * D:1 * D])
            f_g = jax.nn.sigmoid(gates[:, 1 * D:2 * D])
            g_g = jnp.tanh(gates[:, 2 * D:3 * D])
            o_g = jax.nn.sigmoid(gates[:, 3 * D:4 * D])
            c_new = f_g * c_prev + i_g * g_g
            h_new = o_g * jnp.tanh(c_new)
            c_scr[l] = c_new
            h_scr[l] = h_new
            x = h_new
        q = x                                      # [Bt, D]

        # ---- attention over nodes: VPU multiply + XLU reduce ---------------
        feat = feat_ref[...].astype(jnp.float32)   # re-read each iter (VMEM vld)
        e = jnp.sum(feat * q[:, None, :], axis=-1)             # [Bt, N]
        e_max = jnp.max(e, axis=-1, keepdims=True)
        p = jnp.exp(e - e_max)
        denom = jnp.sum(p, axis=-1, keepdims=True)
        alpha = p / denom                                      # exact divide
        readout = jnp.sum(feat * alpha[:, :, None], axis=1)    # [Bt, D]
        r_scr[...] = readout

    # ---- lane-dense output store, no concats -------------------------------
    if out_pad > 2 * D:
        out_ref[:, 2 * D:] = jnp.zeros((Bt, out_pad - 2 * D), out_ref.dtype)
    out_ref[:, 0:D] = h_scr[n_layers - 1].astype(out_ref.dtype)
    out_ref[:, D:2 * D] = r_scr[...].astype(out_ref.dtype)


# ----------------------------------------------------------------------------
# Tiling / VMEM policy.
# ----------------------------------------------------------------------------
def _pick_b_tile(B, N, D, feat_itemsize=4, feat_budget_bytes=24 << 20):
    # Double-buffered feat tile must fit the budget (safe on v7x's 64 MiB VMEM,
    # generous on v5e/v6e's 128 MiB).
    bytes_per_row = 2 * N * D * feat_itemsize
    max_rows = max(8, feat_budget_bytes // max(bytes_per_row, 1))
    bt = min(B, 512, max_rows)
    if B >= 16:
        # >= 2 grid steps: both v7x TensorCores busy + DMA prefetch overlap.
        bt = min(bt, max(8, (B + 1) // 2))
    if bt < B:
        bt = max(8, (bt // 8) * 8)       # sublane-aligned block when tiling
    return int(bt)


def _vmem_limit_bytes(b_tile, N, D, n_layers, out_pad, feat_itemsize, w_bytes):
    feat_db = 2 * b_tile * N * D * feat_itemsize        # double-buffered input
    out_db = 2 * b_tile * out_pad * 4                   # double-buffered output
    scratch = (2 * n_layers + 1) * b_tile * D * 4       # h, c, readout
    total = feat_db + 2 * w_bytes + out_db + scratch + (4 << 20)
    # raise v5e's 16 MiB default when needed; cap so it also fits v7x (64 MiB).
    return int(min(48 << 20, max(16 << 20, total)))


def _cost_estimate(B, N, D, n_layers, n_iters, feat_itemsize, w_bytes, out_pad):
    gate_matmuls = 3 + 2 * (n_layers - 1)
    flops_lstm = n_iters * gate_matmuls * 2 * B * D * (4 * D)
    flops_attn = n_iters * (4 * B * N * D + 6 * B * N)
    transcendentals = n_iters * (5 * n_layers * B * D + B * N)
    bytes_accessed = B * N * D * feat_itemsize + w_bytes + B * out_pad * 4
    return pl.CostEstimate(flops=int(flops_lstm + flops_attn),
                           transcendentals=int(transcendentals),
                           bytes_accessed=int(bytes_accessed))


# ----------------------------------------------------------------------------
# Wrapper: batch-tiled grid with parallel semantics.
# ----------------------------------------------------------------------------
def set2set_forward(feat, params, n_iters, b_tile=None):
    # feat is consumed in its input dtype (f32 or bf16); kernel upcasts on load.
    B, N, D = feat.shape
    n_layers = len(params)

    if b_tile is None:
        b_tile = _pick_b_tile(B, N, D, feat.dtype.itemsize)
    B_pad = pl.cdiv(B, b_tile) * b_tile
    if B_pad != B:
        feat = jnp.pad(feat, ((0, B_pad - B), (0, 0), (0, 0)))
    num_tiles = B_pad // b_tile

    out_dim = 2 * D
    out_pad = pl.cdiv(out_dim, 128) * 128            # lane-dense output width

    flat_weights = []
    weight_specs = []
    for layer_params in params:
        for w in layer_params:
            w = jnp.asarray(w, jnp.float32)
            flat_weights.append(w)
            # constant index_map -> weights DMA'd once, resident across tiles
            weight_specs.append(pl.BlockSpec(w.shape, lambda i: (0, 0)))
    w_bytes = sum(int(w.size) * 4 for w in flat_weights)

    kernel = functools.partial(_set2set_kernel, n_iters, n_layers, D)

    grid_spec = pltpu.PrefetchScalarGridSpec(
        num_scalar_prefetch=0,
        grid=(num_tiles,),
        in_specs=[pl.BlockSpec((b_tile, N, D), lambda i: (i, 0, 0))]
                 + weight_specs,
        out_specs=pl.BlockSpec((b_tile, out_pad), lambda i: (i, 0)),
        scratch_shapes=[
            pltpu.VMEM((n_layers, b_tile, D), jnp.float32),   # h
            pltpu.VMEM((n_layers, b_tile, D), jnp.float32),   # c
            pltpu.VMEM((b_tile, D), jnp.float32),             # readout
        ],
    )

    out = pl.pallas_call(
        kernel,
        out_shape=jax.ShapeDtypeStruct((B_pad, out_pad), jnp.float32),
        grid_spec=grid_spec,
        compiler_params=pltpu.CompilerParams(
            dimension_semantics=("parallel",),
            vmem_limit_bytes=_vmem_limit_bytes(
                b_tile, N, D, n_layers, out_pad,
                feat.dtype.itemsize, w_bytes)),
        cost_estimate=_cost_estimate(
            B_pad, N, D, n_layers, n_iters,
            feat.dtype.itemsize, w_bytes, out_pad),
    )(feat, *flat_weights)

    return out[:B, :out_dim]


# ----------------------------------------------------------------------------
# Pure-JAX reference (for correctness checking only).
# ----------------------------------------------------------------------------
def set2set_reference(feat, params, n_iters):
    feat = feat.astype(jnp.float32)
    B, N, D = feat.shape
    n_layers = len(params)
    h = [jnp.zeros((B, D), jnp.float32) for _ in range(n_layers)]
    c = [jnp.zeros((B, D), jnp.float32) for _ in range(n_layers)]
    q = jnp.zeros((B, D), jnp.float32)
    r = jnp.zeros((B, D), jnp.float32)
    for _ in range(n_iters):
        x = None
        for l in range(n_layers):
            if l == 0:
                w_q, w_r, w_h, b = params[0]
                gates = q @ w_q + r @ w_r + h[0] @ w_h + b
            else:
                w_x, w_h, b = params[l]
                gates = x @ w_x + h[l] @ w_h + b
            i_g = jax.nn.sigmoid(gates[:, 0 * D:1 * D])
            f_g = jax.nn.sigmoid(gates[:, 1 * D:2 * D])
            g_g = jnp.tanh(gates[:, 2 * D:3 * D])
            o_g = jax.nn.sigmoid(gates[:, 3 * D:4 * D])
            c[l] = f_g * c[l] + i_g * g_g
            h[l] = o_g * jnp.tanh(c[l])
            x = h[l]
        q = x
        e = jnp.sum(feat * q[:, None, :], axis=-1, keepdims=True)
        alpha = jax.nn.softmax(e, axis=1)
        r = jnp.sum(feat * alpha, axis=1)
    return jnp.concatenate([q, r], axis=-1)


if __name__ == "__main__":
    # Small deterministic example: batch of 2 graphs, 8 nodes each,
    # input_dim = 32, n_iters = 3, n_layers = 2.
    B, N, D = 2, 8, 32
    n_iters, n_layers = 3, 2

    key = jax.random.PRNGKey(0)
    k_feat, k_params = jax.random.split(key)
    feat = jax.random.normal(k_feat, (B, N, D), jnp.float32)
    params = init_lstm_params(k_params, D, n_layers)

    out = set2set_forward(feat, params, n_iters)
    out = jax.block_until_ready(out)

    ref = set2set_reference(feat, params, n_iters)
    assert out.shape == (B, 2 * D)
    # tolerance absorbs MXU vs XLA-dot accumulation differences in f32 matmuls
    assert jnp.allclose(out, ref, atol=1e-2, rtol=1e-2), "mismatch vs reference"

    print("KERNEL_OK")
</pallas_src>

<mosaic_0001>
module attributes {stable_mosaic.version = 11 : i64} {
  func.func @_set2set_kernel(%arg0: i32, %arg1: memref<2x8x32xf32, #tpu.memory_space<vmem>>, %arg2: memref<32x128xf32, #tpu.memory_space<vmem>>, %arg3: memref<32x128xf32, #tpu.memory_space<vmem>>, %arg4: memref<32x128xf32, #tpu.memory_space<vmem>>, %arg5: memref<1x128xf32, #tpu.memory_space<vmem>>, %arg6: memref<32x128xf32, #tpu.memory_space<vmem>>, %arg7: memref<32x128xf32, #tpu.memory_space<vmem>>, %arg8: memref<1x128xf32, #tpu.memory_space<vmem>>, %arg9: memref<2x128xf32, #tpu.memory_space<vmem>>, %arg10: memref<2x2x32xf32, #tpu.memory_space<vmem>>, %arg11: memref<2x2x32xf32, #tpu.memory_space<vmem>>, %arg12: memref<2x32xf32, #tpu.memory_space<vmem>>) attributes {dimension_semantics = [#tpu.dimension_semantics<parallel>], iteration_bounds = array<i64: 1>, scalar_prefetch = 0 : i64, scratch_operands = 3 : i64, tpu.core_type = #tpu.core_type<tc>, window_params = [{transform_indices = @transform_0, window_bounds = array<i64: 2, 8, 32>}, {pipeline_mode = #tpu.pipeline_mode<synchronous>, transform_indices = @transform_1, window_bounds = array<i64: 32, 128>}, {pipeline_mode = #tpu.pipeline_mode<synchronous>, transform_indices = @transform_2, window_bounds = array<i64: 32, 128>}, {pipeline_mode = #tpu.pipeline_mode<synchronous>, transform_indices = @transform_3, window_bounds = array<i64: 32, 128>}, {pipeline_mode = #tpu.pipeline_mode<synchronous>, transform_indices = @transform_4, window_bounds = array<i64: 1, 128>}, {pipeline_mode = #tpu.pipeline_mode<synchronous>, transform_indices = @transform_5, window_bounds = array<i64: 32, 128>}, {pipeline_mode = #tpu.pipeline_mode<synchronous>, transform_indices = @transform_6, window_bounds = array<i64: 32, 128>}, {pipeline_mode = #tpu.pipeline_mode<synchronous>, transform_indices = @transform_7, window_bounds = array<i64: 1, 128>}, {transform_indices = @transform_8, window_bounds = array<i64: 2, 128>}]} {
    %cst = arith.constant 0.000000e+00 : f32
    %0 = vector.broadcast %cst : f32 to vector<2x2x32xf32>
    %c0 = arith.constant 0 : index
    %c0_0 = arith.constant 0 : index
    %c0_1 = arith.constant 0 : index
    %1 = vector.load %arg10[%c0, %c0_0, %c0_1] : memref<2x2x32xf32, #tpu.memory_space<vmem>>, vector<2x2x32xf32>
    tpu.vector_store %arg10[%c0, %c0_0, %c0_1], %0 {strides = array<i32>} : memref<2x2x32xf32, #tpu.memory_space<vmem>>, vector<2x2x32xf32>,
    %cst_2 = arith.constant 0.000000e+00 : f32
    %2 = vector.broadcast %cst_2 : f32 to vector<2x2x32xf32>
    %c0_3 = arith.constant 0 : index
    %c0_4 = arith.constant 0 : index
    %c0_5 = arith.constant 0 : index
    %3 = vector.load %arg11[%c0_3, %c0_4, %c0_5] : memref<2x2x32xf32, #tpu.memory_space<vmem>>, vector<2x2x32xf32>
    tpu.vector_store %arg11[%c0_3, %c0_4, %c0_5], %2 {strides = array<i32>} : memref<2x2x32xf32, #tpu.memory_space<vmem>>, vector<2x2x32xf32>,
    %cst_6 = arith.constant 0.000000e+00 : f32
    %4 = vector.broadcast %cst_6 : f32 to vector<2x32xf32>
    %c0_7 = arith.constant 0 : index
    %c0_8 = arith.constant 0 : index
    %5 = vector.load %arg12[%c0_7, %c0_8] : memref<2x32xf32, #tpu.memory_space<vmem>>, vector<2x32xf32>
    tpu.vector_store %arg12[%c0_7, %c0_8], %4 {strides = array<i32>} : memref<2x32xf32, #tpu.memory_space<vmem>>, vector<2x32xf32>,
    %c0_9 = arith.constant 0 : index
    %c0_10 = arith.constant 0 : index
    %c0_11 = arith.constant 0 : index
    %6 = vector.load %arg10[%c0_9, %c0_10, %c0_11] : memref<2x2x32xf32, #tpu.memory_space<vmem>>, vector<1x2x32xf32>
    %7 = vector.shape_cast %6 : vector<1x2x32xf32> to vector<2x32xf32>
    %c0_12 = arith.constant 0 : index
    %c0_13 = arith.constant 0 : index
    %c0_14 = arith.constant 0 : index
    %8 = vector.load %arg11[%c0_12, %c0_13, %c0_14] : memref<2x2x32xf32, #tpu.memory_space<vmem>>, vector<1x2x32xf32>
    %9 = vector.shape_cast %8 : vector<1x2x32xf32> to vector<2x32xf32>
    %c1 = arith.constant 1 : index
    %c0_15 = arith.constant 0 : index
    %c0_16 = arith.constant 0 : index
    %10 = vector.load %arg10[%c1, %c0_15, %c0_16] : memref<2x2x32xf32, #tpu.memory_space<vmem>>, vector<1x2x32xf32>
    %11 = vector.shape_cast %10 : vector<1x2x32xf32> to vector<2x32xf32>
    %c0_17 = arith.constant 0 : index
    %c0_18 = arith.constant 0 : index
    %12 = vector.load %arg2[%c0_17, %c0_18] : memref<32x128xf32, #tpu.memory_space<vmem>>, vector<32x128xf32>
    %cst_19 = arith.constant dense<0.000000e+00> : vector<2x128xf32>
    %13 = tpu.matmul %11, %12, %cst_19 {dimension_numbers = #tpu.dot_dimension_numbers<[1], [0], [0], [1], [0, 0, 1, 1], [], []>} : vector<2x32xf32>, vector<32x128xf32>, vector<2x128xf32> -> vector<2x128xf32>
    %c0_20 = arith.constant 0 : index
    %c0_21 = arith.constant 0 : index
    %14 = vector.load %arg12[%c0_20, %c0_21] : memref<2x32xf32, #tpu.memory_space<vmem>>, vector<2x32xf32>
    %c0_22 = arith.constant 0 : index
    %c0_23 = arith.constant 0 : index
    %15 = vector.load %arg3[%c0_22, %c0_23] : memref<32x128xf32, #tpu.memory_space<vmem>>, vector<32x128xf32>
    %cst_24 = arith.constant dense<0.000000e+00> : vector<2x128xf32>
    %16 = tpu.matmul %14, %15, %cst_24 {dimension_numbers = #tpu.dot_dimension_numbers<[1], [0], [0], [1], [0, 0, 1, 1], [], []>} : vector<2x32xf32>, vector<32x128xf32>, vector<2x128xf32> -> vector<2x128xf32>
    %17 = arith.addf %13, %16 : vector<2x128xf32>
    %c0_25 = arith.constant 0 : index
    %c0_26 = arith.constant 0 : index
    %18 = vector.load %arg4[%c0_25, %c0_26] : memref<32x128xf32, #tpu.memory_space<vmem>>, vector<32x128xf32>
    %cst_27 = arith.constant dense<0.000000e+00> : vector<2x128xf32>
    %19 = tpu.matmul %7, %18, %cst_27 {dimension_numbers = #tpu.dot_dimension_numbers<[1], [0], [0], [1], [0, 0, 1, 1], [], []>} : vector<2x32xf32>, vector<32x128xf32>, vector<2x128xf32> -> vector<2x128xf32>
    %20 = arith.addf %17, %19 : vector<2x128xf32>
    %c0_28 = arith.constant 0 : index
    %c0_29 = arith.constant 0 : index
    %21 = vector.load %arg5[%c0_28, %c0_29] : memref<1x128xf32, #tpu.memory_space<vmem>>, vector<1x128xf32>
    %22 = vector.broadcast %21 : vector<1x128xf32> to vector<2x128xf32>
    %23 = arith.addf %20, %22 : vector<2x128xf32>
    %24 = vector.extract_strided_slice %23 {offsets = [0, 0], sizes = [2, 32], strides = [1, 1]} : vector<2x128xf32> to vector<2x32xf32>
    %25 = arith.negf %24 : vector<2x32xf32>
    %26 = math.exp %25 : vector<2x32xf32>
    %cst_30 = arith.constant 1.000000e+00 : f32
    %27 = vector.broadcast %cst_30 : f32 to vector<2x32xf32>
    %28 = arith.addf %27, %26 : vector<2x32xf32>
    %29 = arith.divf %27, %28 : vector<2x32xf32>
    %30 = vector.extract_strided_slice %23 {offsets = [0, 32], sizes = [2, 32], strides = [1, 1]} : vector<2x128xf32> to vector<2x32xf32>
    %31 = arith.negf %30 : vector<2x32xf32>
    %32 = math.exp %31 : vector<2x32xf32>
    %cst_31 = arith.constant 1.000000e+00 : f32
    %33 = vector.broadcast %cst_31 : f32 to vector<2x32xf32>
    %34 = arith.addf %33, %32 : vector<2x32xf32>
    %35 = arith.divf %33, %34 : vector<2x32xf32>
    %36 = vector.extract_strided_slice %23 {offsets = [0, 64], sizes = [2, 32], strides = [1, 1]} : vector<2x128xf32> to vector<2x32xf32>
    %37 = math.tanh %36 : vector<2x32xf32>
    %38 = vector.extract_strided_slice %23 {offsets = [0, 96], sizes = [2, 32], strides = [1, 1]} : vector<2x128xf32> to vector<2x32xf32>
    %39 = arith.negf %38 : vector<2x32xf32>
    %40 = math.exp %39 : vector<2x32xf32>
    %cst_32 = arith.constant 1.000000e+00 : f32
    %41 = vector.broadcast %cst_32 : f32 to vector<2x32xf32>
    %42 = arith.addf %41, %40 : vector<2x32xf32>
    %43 = arith.divf %41, %42 : vector<2x32xf32>
    %44 = arith.mulf %35, %9 : vector<2x32xf32>
    %45 = arith.mulf %29, %37 : vector<2x32xf32>
    %46 = arith.addf %44, %45 : vector<2x32xf32>
    %47 = math.tanh %46 : vector<2x32xf32>
    %48 = arith.mulf %43, %47 : vector<2x32xf32>
    %c0_33 = arith.constant 0 : index
    %c0_34 = arith.constant 0 : index
    %c0_35 = arith.constant 0 : index
    %49 = vector.load %arg11[%c0_33, %c0_34, %c0_35] : memref<2x2x32xf32, #tpu.memory_space<vmem>>, vector<1x2x32xf32>
    %50 = vector.shape_cast %49 : vector<1x2x32xf32> to vector<2x32xf32>
    %51 = vector.shape_cast %46 : vector<2x32xf32> to vector<1x2x32xf32>
    tpu.vector_store %arg11[%c0_33, %c0_34, %c0_35], %51 {strides = array<i32>} : memref<2x2x32xf32, #tpu.memory_space<vmem>>, vector<1x2x32xf32>,
    %c0_36 = arith.constant 0 : index
    %c0_37 = arith.constant 0 : index
    %c0_38 = arith.constant 0 : index
    %52 = vector.load %arg10[%c0_36, %c0_37, %c0_38] : memref<2x2x32xf32, #tpu.memory_space<vmem>>, vector<1x2x32xf32>
    %53 = vector.shape_cast %52 : vector<1x2x32xf32> to vector<2x32xf32>
    %54 = vector.shape_cast %48 : vector<2x32xf32> to vector<1x2x32xf32>
    tpu.vector_store %arg10[%c0_36, %c0_37, %c0_38], %54 {strides = array<i32>} : memref<2x2x32xf32, #tpu.memory_space<vmem>>, vector<1x2x32xf32>,
    %c1_39 = arith.constant 1 : index
    %c0_40 = arith.constant 0 : index
    %c0_41 = arith.constant 0 : index
    %55 = vector.load %arg10[%c1_39, %c0_40, %c0_41] : memref<2x2x32xf32, #tpu.memory_space<vmem>>, vector<1x2x32xf32>
    %56 = vector.shape_cast %55 : vector<1x2x32xf32> to vector<2x32xf32>
    %c1_42 = arith.constant 1 : index
    %c0_43 = arith.constant 0 : index
    %c0_44 = arith.constant 0 : index
    %57 = vector.load %arg11[%c1_42, %c0_43, %c0_44] : memref<2x2x32xf32, #tpu.memory_space<vmem>>, vector<1x2x32xf32>
    %58 = vector.shape_cast %57 : vector<1x2x32xf32> to vector<2x32xf32>
    %c0_45 = arith.constant 0 : index
    %c0_46 = arith.constant 0 : index
    %59 = vector.load %arg6[%c0_45, %c0_46] : memref<32x128xf32, #tpu.memory_space<vmem>>, vector<32x128xf32>
    %cst_47 = arith.constant dense<0.000000e+00> : vector<2x128xf32>
    %60 = tpu.matmul %48, %59, %cst_47 {dimension_numbers = #tpu.dot_dimension_numbers<[1], [0], [0], [1], [0, 0, 1, 1], [], []>} : vector<2x32xf32>, vector<32x128xf32>, vector<2x128xf32> -> vector<2x128xf32>
    %c0_48 = arith.constant 0 : index
    %c0_49 = arith.constant 0 : index
    %61 = vector.load %arg7[%c0_48, %c0_49] : memref<32x128xf32, #tpu.memory_space<vmem>>, vector<32x128xf32>
    %cst_50 = arith.constant dense<0.000000e+00> : vector<2x128xf32>
    %62 = tpu.matmul %56, %61, %cst_50 {dimension_numbers = #tpu.dot_dimension_numbers<[1], [0], [0], [1], [0, 0, 1, 1], [], []>} : vector<2x32xf32>, vector<32x128xf32>, vector<2x128xf32> -> vector<2x128xf32>
    %63 = arith.addf %60, %62 : vector<2x128xf32>
    %c0_51 = arith.constant 0 : index
    %c0_52 = arith.constant 0 : index
    %64 = vector.load %arg8[%c0_51, %c0_52] : memref<1x128xf32, #tpu.memory_space<vmem>>, vector<1x128xf32>
    %65 = vector.broadcast %64 : vector<1x128xf32> to vector<2x128xf32>
    %66 = arith.addf %63, %65 : vector<2x128xf32>
    %67 = vector.extract_strided_slice %66 {offsets = [0, 0], sizes = [2, 32], strides = [1, 1]} : vector<2x128xf32> to vector<2x32xf32>
    %68 = arith.negf %67 : vector<2x32xf32>
    %69 = math.exp %68 : vector<2x32xf32>
    %cst_53 = arith.constant 1.000000e+00 : f32
    %70 = vector.broadcast %cst_53 : f32 to vector<2x32xf32>
    %71 = arith.addf %70, %69 : vector<2x32xf32>
    %72 = arith.divf %70, %71 : vector<2x32xf32>
    %73 = vector.extract_strided_slice %66 {offsets = [0, 32], sizes = [2, 32], strides = [1, 1]} : vector<2x128xf32> to vector<2x32xf32>
    %74 = arith.negf %73 : vector<2x32xf32>
    %75 = math.exp %74 : vector<2x32xf32>
    %cst_54 = arith.constant 1.000000e+00 : f32
    %76 = vector.broadcast %cst_54 : f32 to vector<2x32xf32>
    %77 = arith.addf %76, %75 : vector<2x32xf32>
    %78 = arith.divf %76, %77 : vector<2x32xf32>
    %79 = vector.extract_strided_slice %66 {offsets = [0, 64], sizes = [2, 32], strides = [1, 1]} : vector<2x128xf32> to vector<2x32xf32>
    %80 = math.tanh %79 : vector<2x32xf32>
    %81 = vector.extract_strided_slice %66 {offsets = [0, 96], sizes = [2, 32], strides = [1, 1]} : vector<2x128xf32> to vector<2x32xf32>
    %82 = arith.negf %81 : vector<2x32xf32>
    %83 = math.exp %82 : vector<2x32xf32>
    %cst_55 = arith.constant 1.000000e+00 : f32
    %84 = vector.broadcast %cst_55 : f32 to vector<2x32xf32>
    %85 = arith.addf %84, %83 : vector<2x32xf32>
    %86 = arith.divf %84, %85 : vector<2x32xf32>
    %87 = arith.mulf %78, %58 : vector<2x32xf32>
    %88 = arith.mulf %72, %80 : vector<2x32xf32>
    %89 = arith.addf %87, %88 : vector<2x32xf32>
    %90 = math.tanh %89 : vector<2x32xf32>
    %91 = arith.mulf %86, %90 : vector<2x32xf32>
    %c1_56 = arith.constant 1 : index
    %c0_57 = arith.constant 0 : index
    %c0_58 = arith.constant 0 : index
    %92 = vector.load %arg11[%c1_56, %c0_57, %c0_58] : memref<2x2x32xf32, #tpu.memory_space<vmem>>, vector<1x2x32xf32>
    %93 = vector.shape_cast %92 : vector<1x2x32xf32> to vector<2x32xf32>
    %94 = vector.shape_cast %89 : vector<2x32xf32> to vector<1x2x32xf32>
    tpu.vector_store %arg11[%c1_56, %c0_57, %c0_58], %94 {strides = array<i32>} : memref<2x2x32xf32, #tpu.memory_space<vmem>>, vector<1x2x32xf32>,
    %c1_59 = arith.constant 1 : index
    %c0_60 = arith.constant 0 : index
    %c0_61 = arith.constant 0 : index
    %95 = vector.load %arg10[%c1_59, %c0_60, %c0_61] : memref<2x2x32xf32, #tpu.memory_space<vmem>>, vector<1x2x32xf32>
    %96 = vector.shape_cast %95 : vector<1x2x32xf32> to vector<2x32xf32>
    %97 = vector.shape_cast %91 : vector<2x32xf32> to vector<1x2x32xf32>
    tpu.vector_store %arg10[%c1_59, %c0_60, %c0_61], %97 {strides = array<i32>} : memref<2x2x32xf32, #tpu.memory_space<vmem>>, vector<1x2x32xf32>,
    %c0_62 = arith.constant 0 : index
    %c0_63 = arith.constant 0 : index
    %c0_64 = arith.constant 0 : index
    %98 = vector.load %arg1[%c0_62, %c0_63, %c0_64] : memref<2x8x32xf32, #tpu.memory_space<vmem>>, vector<2x8x32xf32>
    %99 = vector.shape_cast %91 : vector<2x32xf32> to vector<2x1x32xf32>
    %100 = vector.broadcast %99 : vector<2x1x32xf32> to vector<2x8x32xf32>
    %101 = arith.mulf %98, %100 : vector<2x8x32xf32>
    %cst_65 = arith.constant dense<0.000000e+00> : vector<2x8xf32>
    %102 = vector.multi_reduction <add>, %101, %cst_65 [2] : vector<2x8x32xf32> to vector<2x8xf32>
    %cst_66 = arith.constant dense<0xFF800000> : vector<2xf32>
    %103 = vector.multi_reduction <maximumf>, %102, %cst_66 [1] : vector<2x8xf32> to vector<2xf32>
    %104 = vector.shape_cast %103 : vector<2xf32> to vector<2x1xf32>
    %105 = vector.broadcast %104 : vector<2x1xf32> to vector<2x8xf32>
    %106 = arith.subf %102, %105 : vector<2x8xf32>
    %107 = math.exp %106 : vector<2x8xf32>
    %cst_67 = arith.constant dense<0.000000e+00> : vector<2xf32>
    %108 = vector.multi_reduction <add>, %107, %cst_67 [1] : vector<2x8xf32> to vector<2xf32>
    %109 = vector.shape_cast %108 : vector<2xf32> to vector<2x1xf32>
    %110 = vector.broadcast %109 : vector<2x1xf32> to vector<2x8xf32>
    %111 = arith.divf %107, %110 : vector<2x8xf32>
    %112 = vector.shape_cast %111 : vector<2x8xf32> to vector<2x8x1xf32>
    %113 = vector.broadcast %112 : vector<2x8x1xf32> to vector<2x8x32xf32>
    %114 = arith.mulf %98, %113 : vector<2x8x32xf32>
    %cst_68 = arith.constant dense<0.000000e+00> : vector<2x32xf32>
    %115 = vector.multi_reduction <add>, %114, %cst_68 [1] : vector<2x8x32xf32> to vector<2x32xf32>
    %c0_69 = arith.constant 0 : index
    %c0_70 = arith.constant 0 : index
    %116 = vector.load %arg12[%c0_69, %c0_70] : memref<2x32xf32, #tpu.memory_space<vmem>>, vector<2x32xf32>
    tpu.vector_store %arg12[%c0_69, %c0_70], %115 {strides = array<i32>} : memref<2x32xf32, #tpu.memory_space<vmem>>, vector<2x32xf32>,
    %c0_71 = arith.constant 0 : index
    %c0_72 = arith.constant 0 : index
    %c0_73 = arith.constant 0 : index
    %117 = vector.load %arg10[%c0_71, %c0_72, %c0_73] : memref<2x2x32xf32, #tpu.memory_space<vmem>>, vector<1x2x32xf32>
    %118 = vector.shape_cast %117 : vector<1x2x32xf32> to vector<2x32xf32>
    %c0_74 = arith.constant 0 : index
    %c0_75 = arith.constant 0 : index
    %c0_76 = arith.constant 0 : index
    %119 = vector.load %arg11[%c0_74, %c0_75, %c0_76] : memref<2x2x32xf32, #tpu.memory_space<vmem>>, vector<1x2x32xf32>
    %120 = vector.shape_cast %119 : vector<1x2x32xf32> to vector<2x32xf32>
    %c1_77 = arith.constant 1 : index
    %c0_78 = arith.constant 0 : index
    %c0_79 = arith.constant 0 : index
    %121 = vector.load %arg10[%c1_77, %c0_78, %c0_79] : memref<2x2x32xf32, #tpu.memory_space<vmem>>, vector<1x2x32xf32>
    %122 = vector.shape_cast %121 : vector<1x2x32xf32> to vector<2x32xf32>
    %c0_80 = arith.constant 0 : index
    %c0_81 = arith.constant 0 : index
    %123 = vector.load %arg2[%c0_80, %c0_81] : memref<32x128xf32, #tpu.memory_space<vmem>>, vector<32x128xf32>
    %cst_82 = arith.constant dense<0.000000e+00> : vector<2x128xf32>
    %124 = tpu.matmul %122, %123, %cst_82 {dimension_numbers = #tpu.dot_dimension_numbers<[1], [0], [0], [1], [0, 0, 1, 1], [], []>} : vector<2x32xf32>, vector<32x128xf32>, vector<2x128xf32> -> vector<2x128xf32>
    %c0_83 = arith.constant 0 : index
    %c0_84 = arith.constant 0 : index
    %125 = vector.load %arg12[%c0_83, %c0_84] : memref<2x32xf32, #tpu.memory_space<vmem>>, vector<2x32xf32>
    %c0_85 = arith.constant 0 : index
    %c0_86 = arith.constant 0 : index
    %126 = vector.load %arg3[%c0_85, %c0_86] : memref<32x128xf32, #tpu.memory_space<vmem>>, vector<32x128xf32>
    %cst_87 = arith.constant dense<0.000000e+00> : vector<2x128xf32>
    %127 = tpu.matmul %125, %126, %cst_87 {dimension_numbers = #tpu.dot_dimension_numbers<[1], [0], [0], [1], [0, 0, 1, 1], [], []>} : vector<2x32xf32>, vector<32x128xf32>, vector<2x128xf32> -> vector<2x128xf32>
    %128 = arith.addf %124, %127 : vector<2x128xf32>
    %c0_88 = arith.constant 0 : index
    %c0_89 = arith.constant 0 : index
    %129 = vector.load %arg4[%c0_88, %c0_89] : memref<32x128xf32, #tpu.memory_space<vmem>>, vector<32x128xf32>
    %cst_90 = arith.constant dense<0.000000e+00> : vector<2x128xf32>
    %130 = tpu.matmul %118, %129, %cst_90 {dimension_numbers = #tpu.dot_dimension_numbers<[1], [0], [0], [1], [0, 0, 1, 1], [], []>} : vector<2x32xf32>, vector<32x128xf32>, vector<2x128xf32> -> vector<2x128xf32>
    %131 = arith.addf %128, %130 : vector<2x128xf32>
    %c0_91 = arith.constant 0 : index
    %c0_92 = arith.constant 0 : index
    %132 = vector.load %arg5[%c0_91, %c0_92] : memref<1x128xf32, #tpu.memory_space<vmem>>, vector<1x128xf32>
    %133 = vector.broadcast %132 : vector<1x128xf32> to vector<2x128xf32>
    %134 = arith.addf %131, %133 : vector<2x128xf32>
    %135 = vector.extract_strided_slice %134 {offsets = [0, 0], sizes = [2, 32], strides = [1, 1]} : vector<2x128xf32> to vector<2x32xf32>
    %136 = arith.negf %135 : vector<2x32xf32>
    %137 = math.exp %136 : vector<2x32xf32>
    %cst_93 = arith.constant 1.000000e+00 : f32
    %138 = vector.broadcast %cst_93 : f32 to vector<2x32xf32>
    %139 = arith.addf %138, %137 : vector<2x32xf32>
    %140 = arith.divf %138, %139 : vector<2x32xf32>
    %141 = vector.extract_strided_slice %134 {offsets = [0, 32], sizes = [2, 32], strides = [1, 1]} : vector<2x128xf32> to vector<2x32xf32>
    %142 = arith.negf %141 : vector<2x32xf32>
    %143 = math.exp %142 : vector<2x32xf32>
    %cst_94 = arith.constant 1.000000e+00 : f32
    %144 = vector.broadcast %cst_94 : f32 to vector<2x32xf32>
    %145 = arith.addf %144, %143 : vector<2x32xf32>
    %146 = arith.divf %144, %145 : vector<2x32xf32>
    %147 = vector.extract_strided_slice %134 {offsets = [0, 64], sizes = [2, 32], strides = [1, 1]} : vector<2x128xf32> to vector<2x32xf32>
    %148 = math.tanh %147 : vector<2x32xf32>
    %149 = vector.extract_strided_slice %134 {offsets = [0, 96], sizes = [2, 32], strides = [1, 1]} : vector<2x128xf32> to vector<2x32xf32>
    %150 = arith.negf %149 : vector<2x32xf32>
    %151 = math.exp %150 : vector<2x32xf32>
    %cst_95 = arith.constant 1.000000e+00 : f32
    %152 = vector.broadcast %cst_95 : f32 to vector<2x32xf32>
    %153 = arith.addf %152, %151 : vector<2x32xf32>
    %154 = arith.divf %152, %153 : vector<2x32xf32>
    %155 = arith.mulf %146, %120 : vector<2x32xf32>
    %156 = arith.mulf %140, %148 : vector<2x32xf32>
    %157 = arith.addf %155, %156 : vector<2x32xf32>
    %158 = math.tanh %157 : vector<2x32xf32>
    %159 = arith.mulf %154, %158 : vector<2x32xf32>
    %c0_96 = arith.constant 0 : index
    %c0_97 = arith.constant 0 : index
    %c0_98 = arith.constant 0 : index
    %160 = vector.load %arg11[%c0_96, %c0_97, %c0_98] : memref<2x2x32xf32, #tpu.memory_space<vmem>>, vector<1x2x32xf32>
    %161 = vector.shape_cast %160 : vector<1x2x32xf32> to vector<2x32xf32>
    %162 = vector.shape_cast %157 : vector<2x32xf32> to vector<1x2x32xf32>
    tpu.vector_store %arg11[%c0_96, %c0_97, %c0_98], %162 {strides = array<i32>} : memref<2x2x32xf32, #tpu.memory_space<vmem>>, vector<1x2x32xf32>,
    %c0_99 = arith.constant 0 : index
    %c0_100 = arith.constant 0 : index
    %c0_101 = arith.constant 0 : index
    %163 = vector.load %arg10[%c0_99, %c0_100, %c0_101] : memref<2x2x32xf32, #tpu.memory_space<vmem>>, vector<1x2x32xf32>
    %164 = vector.shape_cast %163 : vector<1x2x32xf32> to vector<2x32xf32>
    %165 = vector.shape_cast %159 : vector<2x32xf32> to vector<1x2x32xf32>
    tpu.vector_store %arg10[%c0_99, %c0_100, %c0_101], %165 {strides = array<i32>} : memref<2x2x32xf32, #tpu.memory_space<vmem>>, vector<1x2x32xf32>,
    %c1_102 = arith.constant 1 : index
    %c0_103 = arith.constant 0 : index
    %c0_104 = arith.constant 0 : index
    %166 = vector.load %arg10[%c1_102, %c0_103, %c0_104] : memref<2x2x32xf32, #tpu.memory_space<vmem>>, vector<1x2x32xf32>
    %167 = vector.shape_cast %166 : vector<1x2x32xf32> to vector<2x32xf32>
    %c1_105 = arith.constant 1 : index
    %c0_106 = arith.constant 0 : index
    %c0_107 = arith.constant 0 : index
    %168 = vector.load %arg11[%c1_105, %c0_106, %c0_107] : memref<2x2x32xf32, #tpu.memory_space<vmem>>, vector<1x2x32xf32>
    %169 = vector.shape_cast %168 : vector<1x2x32xf32> to vector<2x32xf32>
    %c0_108 = arith.constant 0 : index
    %c0_109 = arith.constant 0 : index
    %170 = vector.load %arg6[%c0_108, %c0_109] : memref<32x128xf32, #tpu.memory_space<vmem>>, vector<32x128xf32>
    %cst_110 = arith.constant dense<0.000000e+00> : vector<2x128xf32>
    %171 = tpu.matmul %159, %170, %cst_110 {dimension_numbers = #tpu.dot_dimension_numbers<[1], [0], [0], [1], [0, 0, 1, 1], [], []>} : vector<2x32xf32>, vector<32x128xf32>, vector<2x128xf32> -> vector<2x128xf32>
    %c0_111 = arith.constant 0 : index
    %c0_112 = arith.constant 0 : index
    %172 = vector.load %arg7[%c0_111, %c0_112] : memref<32x128xf32, #tpu.memory_space<vmem>>, vector<32x128xf32>
    %cst_113 = arith.constant dense<0.000000e+00> : vector<2x128xf32>
    %173 = tpu.matmul %167, %172, %cst_113 {dimension_numbers = #tpu.dot_dimension_numbers<[1], [0], [0], [1], [0, 0, 1, 1], [], []>} : vector<2x32xf32>, vector<32x128xf32>, vector<2x128xf32> -> vector<2x128xf32>
    %174 = arith.addf %171, %173 : vector<2x128xf32>
    %c0_114 = arith.constant 0 : index
    %c0_115 = arith.constant 0 : index
    %175 = vector.load %arg8[%c0_114, %c0_115] : memref<1x128xf32, #tpu.memory_space<vmem>>, vector<1x128xf32>
    %176 = vector.broadcast %175 : vector<1x128xf32> to vector<2x128xf32>
    %177 = arith.addf %174, %176 : vector<2x128xf32>
    %178 = vector.extract_strided_slice %177 {offsets = [0, 0], sizes = [2, 32], strides = [1, 1]} : vector<2x128xf32> to vector<2x32xf32>
    %179 = arith.negf %178 : vector<2x32xf32>
    %180 = math.exp %179 : vector<2x32xf32>
    %cst_116 = arith.constant 1.000000e+00 : f32
    %181 = vector.broadcast %cst_116 : f32 to vector<2x32xf32>
    %182 = arith.addf %181, %180 : vector<2x32xf32>
    %183 = arith.divf %181, %182 : vector<2x32xf32>
    %184 = vector.extract_strided_slice %177 {offsets = [0, 32], sizes = [2, 32], strides = [1, 1]} : vector<2x128xf32> to vector<2x32xf32>
    %185 = arith.negf %184 : vector<2x32xf32>
    %186 = math.exp %185 : vector<2x32xf32>
    %cst_117 = arith.constant 1.000000e+00 : f32
    %187 = vector.broadcast %cst_117 : f32 to vector<2x32xf32>
    %188 = arith.addf %187, %186 : vector<2x32xf32>
    %189 = arith.divf %187, %188 : vector<2x32xf32>
    %190 = vector.extract_strided_slice %177 {offsets = [0, 64], sizes = [2, 32], strides = [1, 1]} : vector<2x128xf32> to vector<2x32xf32>
    %191 = math.tanh %190 : vector<2x32xf32>
    %192 = vector.extract_strided_slice %177 {offsets = [0, 96], sizes = [2, 32], strides = [1, 1]} : vector<2x128xf32> to vector<2x32xf32>
    %193 = arith.negf %192 : vector<2x32xf32>
    %194 = math.exp %193 : vector<2x32xf32>
    %cst_118 = arith.constant 1.000000e+00 : f32
    %195 = vector.broadcast %cst_118 : f32 to vector<2x32xf32>
    %196 = arith.addf %195, %194 : vector<2x32xf32>
    %197 = arith.divf %195, %196 : vector<2x32xf32>
    %198 = arith.mulf %189, %169 : vector<2x32xf32>
    %199 = arith.mulf %183, %191 : vector<2x32xf32>
    %200 = arith.addf %198, %199 : vector<2x32xf32>
    %201 = math.tanh %200 : vector<2x32xf32>
    %202 = arith.mulf %197, %201 : vector<2x32xf32>
    %c1_119 = arith.constant 1 : index
    %c0_120 = arith.constant 0 : index
    %c0_121 = arith.constant 0 : index
    %203 = vector.load %arg11[%c1_119, %c0_120, %c0_121] : memref<2x2x32xf32, #tpu.memory_space<vmem>>, vector<1x2x32xf32>
    %204 = vector.shape_cast %203 : vector<1x2x32xf32> to vector<2x32xf32>
    %205 = vector.shape_cast %200 : vector<2x32xf32> to vector<1x2x32xf32>
    tpu.vector_store %arg11[%c1_119, %c0_120, %c0_121], %205 {strides = array<i32>} : memref<2x2x32xf32, #tpu.memory_space<vmem>>, vector<1x2x32xf32>,
    %c1_122 = arith.constant 1 : index
    %c0_123 = arith.constant 0 : index
    %c0_124 = arith.constant 0 : index
    %206 = vector.load %arg10[%c1_122, %c0_123, %c0_124] : memref<2x2x32xf32, #tpu.memory_space<vmem>>, vector<1x2x32xf32>
    %207 = vector.shape_cast %206 : vector<1x2x32xf32> to vector<2x32xf32>
    %208 = vector.shape_cast %202 : vector<2x32xf32> to vector<1x2x32xf32>
    tpu.vector_store %arg10[%c1_122, %c0_123, %c0_124], %208 {strides = array<i32>} : memref<2x2x32xf32, #tpu.memory_space<vmem>>, vector<1x2x32xf32>,
    %c0_125 = arith.constant 0 : index
    %c0_126 = arith.constant 0 : index
    %c0_127 = arith.constant 0 : index
    %209 = vector.load %arg1[%c0_125, %c0_126, %c0_127] : memref<2x8x32xf32, #tpu.memory_space<vmem>>, vector<2x8x32xf32>
    %210 = vector.shape_cast %202 : vector<2x32xf32> to vector<2x1x32xf32>
    %211 = vector.broadcast %210 : vector<2x1x32xf32> to vector<2x8x32xf32>
    %212 = arith.mulf %209, %211 : vector<2x8x32xf32>
    %cst_128 = arith.constant dense<0.000000e+00> : vector<2x8xf32>
    %213 = vector.multi_reduction <add>, %212, %cst_128 [2] : vector<2x8x32xf32> to vector<2x8xf32>
    %cst_129 = arith.constant dense<0xFF800000> : vector<2xf32>
    %214 = vector.multi_reduction <maximumf>, %213, %cst_129 [1] : vector<2x8xf32> to vector<2xf32>
    %215 = vector.shape_cast %214 : vector<2xf32> to vector<2x1xf32>
    %216 = vector.broadcast %215 : vector<2x1xf32> to vector<2x8xf32>
    %217 = arith.subf %213, %216 : vector<2x8xf32>
    %218 = math.exp %217 : vector<2x8xf32>
    %cst_130 = arith.constant dense<0.000000e+00> : vector<2xf32>
    %219 = vector.multi_reduction <add>, %218, %cst_130 [1] : vector<2x8xf32> to vector<2xf32>
    %220 = vector.shape_cast %219 : vector<2xf32> to vector<2x1xf32>
    %221 = vector.broadcast %220 : vector<2x1xf32> to vector<2x8xf32>
    %222 = arith.divf %218, %221 : vector<2x8xf32>
    %223 = vector.shape_cast %222 : vector<2x8xf32> to vector<2x8x1xf32>
    %224 = vector.broadcast %223 : vector<2x8x1xf32> to vector<2x8x32xf32>
    %225 = arith.mulf %209, %224 : vector<2x8x32xf32>
    %cst_131 = arith.constant dense<0.000000e+00> : vector<2x32xf32>
    %226 = vector.multi_reduction <add>, %225, %cst_131 [1] : vector<2x8x32xf32> to vector<2x32xf32>
    %c0_132 = arith.constant 0 : index
    %c0_133 = arith.constant 0 : index
    %227 = vector.load %arg12[%c0_132, %c0_133] : memref<2x32xf32, #tpu.memory_space<vmem>>, vector<2x32xf32>
    tpu.vector_store %arg12[%c0_132, %c0_133], %226 {strides = array<i32>} : memref<2x32xf32, #tpu.memory_space<vmem>>, vector<2x32xf32>,
    %c0_134 = arith.constant 0 : index
    %c0_135 = arith.constant 0 : index
    %c0_136 = arith.constant 0 : index
    %228 = vector.load %arg10[%c0_134, %c0_135, %c0_136] : memref<2x2x32xf32, #tpu.memory_space<vmem>>, vector<1x2x32xf32>
    %229 = vector.shape_cast %228 : vector<1x2x32xf32> to vector<2x32xf32>
    %c0_137 = arith.constant 0 : index
    %c0_138 = arith.constant 0 : index
    %c0_139 = arith.constant 0 : index
    %230 = vector.load %arg11[%c0_137, %c0_138, %c0_139] : memref<2x2x32xf32, #tpu.memory_space<vmem>>, vector<1x2x32xf32>
    %231 = vector.shape_cast %230 : vector<1x2x32xf32> to vector<2x32xf32>
    %c1_140 = arith.constant 1 : index
    %c0_141 = arith.constant 0 : index
    %c0_142 = arith.constant 0 : index
    %232 = vector.load %arg10[%c1_140, %c0_141, %c0_142] : memref<2x2x32xf32, #tpu.memory_space<vmem>>, vector<1x2x32xf32>
    %233 = vector.shape_cast %232 : vector<1x2x32xf32> to vector<2x32xf32>
    %c0_143 = arith.constant 0 : index
    %c0_144 = arith.constant 0 : index
    %234 = vector.load %arg2[%c0_143, %c0_144] : memref<32x128xf32, #tpu.memory_space<vmem>>, vector<32x128xf32>
    %cst_145 = arith.constant dense<0.000000e+00> : vector<2x128xf32>
    %235 = tpu.matmul %233, %234, %cst_145 {dimension_numbers = #tpu.dot_dimension_numbers<[1], [0], [0], [1], [0, 0, 1, 1], [], []>} : vector<2x32xf32>, vector<32x128xf32>, vector<2x128xf32> -> vector<2x128xf32>
    %c0_146 = arith.constant 0 : index
    %c0_147 = arith.constant 0 : index
    %236 = vector.load %arg12[%c0_146, %c0_147] : memref<2x32xf32, #tpu.memory_space<vmem>>, vector<2x32xf32>
    %c0_148 = arith.constant 0 : index
    %c0_149 = arith.constant 0 : index
    %237 = vector.load %arg3[%c0_148, %c0_149] : memref<32x128xf32, #tpu.memory_space<vmem>>, vector<32x128xf32>
    %cst_150 = arith.constant dense<0.000000e+00> : vector<2x128xf32>
    %238 = tpu.matmul %236, %237, %cst_150 {dimension_numbers = #tpu.dot_dimension_numbers<[1], [0], [0], [1], [0, 0, 1, 1], [], []>} : vector<2x32xf32>, vector<32x128xf32>, vector<2x128xf32> -> vector<2x128xf32>
    %239 = arith.addf %235, %238 : vector<2x128xf32>
    %c0_151 = arith.constant 0 : index
    %c0_152 = arith.constant 0 : index
    %240 = vector.load %arg4[%c0_151, %c0_152] : memref<32x128xf32, #tpu.memory_space<vmem>>, vector<32x128xf32>
    %cst_153 = arith.constant dense<0.000000e+00> : vector<2x128xf32>
    %241 = tpu.matmul %229, %240, %cst_153 {dimension_numbers = #tpu.dot_dimension_numbers<[1], [0], [0], [1], [0, 0, 1, 1], [], []>} : vector<2x32xf32>, vector<32x128xf32>, vector<2x128xf32> -> vector<2x128xf32>
    %242 = arith.addf %239, %241 : vector<2x128xf32>
    %c0_154 = arith.constant 0 : index
    %c0_155 = arith.constant 0 : index
    %243 = vector.load %arg5[%c0_154, %c0_155] : memref<1x128xf32, #tpu.memory_space<vmem>>, vector<1x128xf32>
    %244 = vector.broadcast %243 : vector<1x128xf32> to vector<2x128xf32>
    %245 = arith.addf %242, %244 : vector<2x128xf32>
    %246 = vector.extract_strided_slice %245 {offsets = [0, 0], sizes = [2, 32], strides = [1, 1]} : vector<2x128xf32> to vector<2x32xf32>
    %247 = arith.negf %246 : vector<2x32xf32>
    %248 = math.exp %247 : vector<2x32xf32>
    %cst_156 = arith.constant 1.000000e+00 : f32
    %249 = vector.broadcast %cst_156 : f32 to vector<2x32xf32>
    %250 = arith.addf %249, %248 : vector<2x32xf32>
    %251 = arith.divf %249, %250 : vector<2x32xf32>
    %252 = vector.extract_strided_slice %245 {offsets = [0, 32], sizes = [2, 32], strides = [1, 1]} : vector<2x128xf32> to vector<2x32xf32>
    %253 = arith.negf %252 : vector<2x32xf32>
    %254 = math.exp %253 : vector<2x32xf32>
    %cst_157 = arith.constant 1.000000e+00 : f32
    %255 = vector.broadcast %cst_157 : f32 to vector<2x32xf32>
    %256 = arith.addf %255, %254 : vector<2x32xf32>
    %257 = arith.divf %255, %256 : vector<2x32xf32>
    %258 = vector.extract_strided_slice %245 {offsets = [0, 64], sizes = [2, 32], strides = [1, 1]} : vector<2x128xf32> to vector<2x32xf32>
    %259 = math.tanh %258 : vector<2x32xf32>
    %260 = vector.extract_strided_slice %245 {offsets = [0, 96], sizes = [2, 32], strides = [1, 1]} : vector<2x128xf32> to vector<2x32xf32>
    %261 = arith.negf %260 : vector<2x32xf32>
    %262 = math.exp %261 : vector<2x32xf32>
    %cst_158 = arith.constant 1.000000e+00 : f32
    %263 = vector.broadcast %cst_158 : f32 to vector<2x32xf32>
    %264 = arith.addf %263, %262 : vector<2x32xf32>
    %265 = arith.divf %263, %264 : vector<2x32xf32>
    %266 = arith.mulf %257, %231 : vector<2x32xf32>
    %267 = arith.mulf %251, %259 : vector<2x32xf32>
    %268 = arith.addf %266, %267 : vector<2x32xf32>
    %269 = math.tanh %268 : vector<2x32xf32>
    %270 = arith.mulf %265, %269 : vector<2x32xf32>
    %c0_159 = arith.constant 0 : index
    %c0_160 = arith.constant 0 : index
    %c0_161 = arith.constant 0 : index
    %271 = vector.load %arg11[%c0_159, %c0_160, %c0_161] : memref<2x2x32xf32, #tpu.memory_space<vmem>>, vector<1x2x32xf32>
    %272 = vector.shape_cast %271 : vector<1x2x32xf32> to vector<2x32xf32>
    %273 = vector.shape_cast %268 : vector<2x32xf32> to vector<1x2x32xf32>
    tpu.vector_store %arg11[%c0_159, %c0_160, %c0_161], %273 {strides = array<i32>} : memref<2x2x32xf32, #tpu.memory_space<vmem>>, vector<1x2x32xf32>,
    %c0_162 = arith.constant 0 : index
    %c0_163 = arith.constant 0 : index
    %c0_164 = arith.constant 0 : index
    %274 = vector.load %arg10[%c0_162, %c0_163, %c0_164] : memref<2x2x32xf32, #tpu.memory_space<vmem>>, vector<1x2x32xf32>
    %275 = vector.shape_cast %274 : vector<1x2x32xf32> to vector<2x32xf32>
    %276 = vector.shape_cast %270 : vector<2x32xf32> to vector<1x2x32xf32>
    tpu.vector_store %arg10[%c0_162, %c0_163, %c0_164], %276 {strides = array<i32>} : memref<2x2x32xf32, #tpu.memory_space<vmem>>, vector<1x2x32xf32>,
    %c1_165 = arith.constant 1 : index
    %c0_166 = arith.constant 0 : index
    %c0_167 = arith.constant 0 : index
    %277 = vector.load %arg10[%c1_165, %c0_166, %c0_167] : memref<2x2x32xf32, #tpu.memory_space<vmem>>, vector<1x2x32xf32>
    %278 = vector.shape_cast %277 : vector<1x2x32xf32> to vector<2x32xf32>
    %c1_168 = arith.constant 1 : index
    %c0_169 = arith.constant 0 : index
    %c0_170 = arith.constant 0 : index
    %279 = vector.load %arg11[%c1_168, %c0_169, %c0_170] : memref<2x2x32xf32, #tpu.memory_space<vmem>>, vector<1x2x32xf32>
    %280 = vector.shape_cast %279 : vector<1x2x32xf32> to vector<2x32xf32>
    %c0_171 = arith.constant 0 : index
    %c0_172 = arith.constant 0 : index
    %281 = vector.load %arg6[%c0_171, %c0_172] : memref<32x128xf32, #tpu.memory_space<vmem>>, vector<32x128xf32>
    %cst_173 = arith.constant dense<0.000000e+00> : vector<2x128xf32>
    %282 = tpu.matmul %270, %281, %cst_173 {dimension_numbers = #tpu.dot_dimension_numbers<[1], [0], [0], [1], [0, 0, 1, 1], [], []>} : vector<2x32xf32>, vector<32x128xf32>, vector<2x128xf32> -> vector<2x128xf32>
    %c0_174 = arith.constant 0 : index
    %c0_175 = arith.constant 0 : index
    %283 = vector.load %arg7[%c0_174, %c0_175] : memref<32x128xf32, #tpu.memory_space<vmem>>, vector<32x128xf32>
    %cst_176 = arith.constant dense<0.000000e+00> : vector<2x128xf32>
    %284 = tpu.matmul %278, %283, %cst_176 {dimension_numbers = #tpu.dot_dimension_numbers<[1], [0], [0], [1], [0, 0, 1, 1], [], []>} : vector<2x32xf32>, vector<32x128xf32>, vector<2x128xf32> -> vector<2x128xf32>
    %285 = arith.addf %282, %284 : vector<2x128xf32>
    %c0_177 = arith.constant 0 : index
    %c0_178 = arith.constant 0 : index
    %286 = vector.load %arg8[%c0_177, %c0_178] : memref<1x128xf32, #tpu.memory_space<vmem>>, vector<1x128xf32>
    %287 = vector.broadcast %286 : vector<1x128xf32> to vector<2x128xf32>
    %288 = arith.addf %285, %287 : vector<2x128xf32>
    %289 = vector.extract_strided_slice %288 {offsets = [0, 0], sizes = [2, 32], strides = [1, 1]} : vector<2x128xf32> to vector<2x32xf32>
    %290 = arith.negf %289 : vector<2x32xf32>
    %291 = math.exp %290 : vector<2x32xf32>
    %cst_179 = arith.constant 1.000000e+00 : f32
    %292 = vector.broadcast %cst_179 : f32 to vector<2x32xf32>
    %293 = arith.addf %292, %291 : vector<2x32xf32>
    %294 = arith.divf %292, %293 : vector<2x32xf32>
    %295 = vector.extract_strided_slice %288 {offsets = [0, 32], sizes = [2, 32], strides = [1, 1]} : vector<2x128xf32> to vector<2x32xf32>
    %296 = arith.negf %295 : vector<2x32xf32>
    %297 = math.exp %296 : vector<2x32xf32>
    %cst_180 = arith.constant 1.000000e+00 : f32
    %298 = vector.broadcast %cst_180 : f32 to vector<2x32xf32>
    %299 = arith.addf %298, %297 : vector<2x32xf32>
    %300 = arith.divf %298, %299 : vector<2x32xf32>
    %301 = vector.extract_strided_slice %288 {offsets = [0, 64], sizes = [2, 32], strides = [1, 1]} : vector<2x128xf32> to vector<2x32xf32>
    %302 = math.tanh %301 : vector<2x32xf32>
    %303 = vector.extract_strided_slice %288 {offsets = [0, 96], sizes = [2, 32], strides = [1, 1]} : vector<2x128xf32> to vector<2x32xf32>
    %304 = arith.negf %303 : vector<2x32xf32>
    %305 = math.exp %304 : vector<2x32xf32>
    %cst_181 = arith.constant 1.000000e+00 : f32
    %306 = vector.broadcast %cst_181 : f32 to vector<2x32xf32>
    %307 = arith.addf %306, %305 : vector<2x32xf32>
    %308 = arith.divf %306, %307 : vector<2x32xf32>
    %309 = arith.mulf %300, %280 : vector<2x32xf32>
    %310 = arith.mulf %294, %302 : vector<2x32xf32>
    %311 = arith.addf %309, %310 : vector<2x32xf32>
    %312 = math.tanh %311 : vector<2x32xf32>
    %313 = arith.mulf %308, %312 : vector<2x32xf32>
    %c1_182 = arith.constant 1 : index
    %c0_183 = arith.constant 0 : index
    %c0_184 = arith.constant 0 : index
    %314 = vector.load %arg11[%c1_182, %c0_183, %c0_184] : memref<2x2x32xf32, #tpu.memory_space<vmem>>, vector<1x2x32xf32>
    %315 = vector.shape_cast %314 : vector<1x2x32xf32> to vector<2x32xf32>
    %316 = vector.shape_cast %311 : vector<2x32xf32> to vector<1x2x32xf32>
    tpu.vector_store %arg11[%c1_182, %c0_183, %c0_184], %316 {strides = array<i32>} : memref<2x2x32xf32, #tpu.memory_space<vmem>>, vector<1x2x32xf32>,
    %c1_185 = arith.constant 1 : index
    %c0_186 = arith.constant 0 : index
    %c0_187 = arith.constant 0 : index
    %317 = vector.load %arg10[%c1_185, %c0_186, %c0_187] : memref<2x2x32xf32, #tpu.memory_space<vmem>>, vector<1x2x32xf32>
    %318 = vector.shape_cast %317 : vector<1x2x32xf32> to vector<2x32xf32>
    %319 = vector.shape_cast %313 : vector<2x32xf32> to vector<1x2x32xf32>
    tpu.vector_store %arg10[%c1_185, %c0_186, %c0_187], %319 {strides = array<i32>} : memref<2x2x32xf32, #tpu.memory_space<vmem>>, vector<1x2x32xf32>,
    %c0_188 = arith.constant 0 : index
    %c0_189 = arith.constant 0 : index
    %c0_190 = arith.constant 0 : index
    %320 = vector.load %arg1[%c0_188, %c0_189, %c0_190] : memref<2x8x32xf32, #tpu.memory_space<vmem>>, vector<2x8x32xf32>
    %321 = vector.shape_cast %313 : vector<2x32xf32> to vector<2x1x32xf32>
    %322 = vector.broadcast %321 : vector<2x1x32xf32> to vector<2x8x32xf32>
    %323 = arith.mulf %320, %322 : vector<2x8x32xf32>
    %cst_191 = arith.constant dense<0.000000e+00> : vector<2x8xf32>
    %324 = vector.multi_reduction <add>, %323, %cst_191 [2] : vector<2x8x32xf32> to vector<2x8xf32>
    %cst_192 = arith.constant dense<0xFF800000> : vector<2xf32>
    %325 = vector.multi_reduction <maximumf>, %324, %cst_192 [1] : vector<2x8xf32> to vector<2xf32>
    %326 = vector.shape_cast %325 : vector<2xf32> to vector<2x1xf32>
    %327 = vector.broadcast %326 : vector<2x1xf32> to vector<2x8xf32>
    %328 = arith.subf %324, %327 : vector<2x8xf32>
    %329 = math.exp %328 : vector<2x8xf32>
    %cst_193 = arith.constant dense<0.000000e+00> : vector<2xf32>
    %330 = vector.multi_reduction <add>, %329, %cst_193 [1] : vector<2x8xf32> to vector<2xf32>
    %331 = vector.shape_cast %330 : vector<2xf32> to vector<2x1xf32>
    %332 = vector.broadcast %331 : vector<2x1xf32> to vector<2x8xf32>
    %333 = arith.divf %329, %332 : vector<2x8xf32>
    %334 = vector.shape_cast %333 : vector<2x8xf32> to vector<2x8x1xf32>
    %335 = vector.broadcast %334 : vector<2x8x1xf32> to vector<2x8x32xf32>
    %336 = arith.mulf %320, %335 : vector<2x8x32xf32>
    %cst_194 = arith.constant dense<0.000000e+00> : vector<2x32xf32>
    %337 = vector.multi_reduction <add>, %336, %cst_194 [1] : vector<2x8x32xf32> to vector<2x32xf32>
    %c0_195 = arith.constant 0 : index
    %c0_196 = arith.constant 0 : index
    %338 = vector.load %arg12[%c0_195, %c0_196] : memref<2x32xf32, #tpu.memory_space<vmem>>, vector<2x32xf32>
    tpu.vector_store %arg12[%c0_195, %c0_196], %337 {strides = array<i32>} : memref<2x32xf32, #tpu.memory_space<vmem>>, vector<2x32xf32>,
    %cst_197 = arith.constant 0.000000e+00 : f32
    %339 = vector.broadcast %cst_197 : f32 to vector<2x64xf32>
    %c0_198 = arith.constant 0 : index
    %c64 = arith.constant 64 : index
    %340 = vector.load %arg9[%c0_198, %c64] : memref<2x128xf32, #tpu.memory_space<vmem>>, vector<2x64xf32>
    tpu.vector_store %arg9[%c0_198, %c64], %339 {strides = array<i32>} : memref<2x128xf32, #tpu.memory_space<vmem>>, vector<2x64xf32>,
    %c1_199 = arith.constant 1 : index
    %c0_200 = arith.constant 0 : index
    %c0_201 = arith.constant 0 : index
    %341 = vector.load %arg10[%c1_199, %c0_200, %c0_201] : memref<2x2x32xf32, #tpu.memory_space<vmem>>, vector<1x2x32xf32>
    %342 = vector.shape_cast %341 : vector<1x2x32xf32> to vector<2x32xf32>
    %c0_202 = arith.constant 0 : index
    %c0_203 = arith.constant 0 : index
    %343 = vector.load %arg9[%c0_202, %c0_203] : memref<2x128xf32, #tpu.memory_space<vmem>>, vector<2x32xf32>
    tpu.vector_store %arg9[%c0_202, %c0_203], %342 {strides = array<i32>} : memref<2x128xf32, #tpu.memory_space<vmem>>, vector<2x32xf32>,
    %c0_204 = arith.constant 0 : index
    %c0_205 = arith.constant 0 : index
    %344 = vector.load %arg12[%c0_204, %c0_205] : memref<2x32xf32, #tpu.memory_space<vmem>>, vector<2x32xf32>
    %c0_206 = arith.constant 0 : index
    %c32 = arith.constant 32 : index
    %345 = vector.load %arg9[%c0_206, %c32] : memref<2x128xf32, #tpu.memory_space<vmem>>, vector<2x32xf32>
    tpu.vector_store %arg9[%c0_206, %c32], %344 {strides = array<i32>} : memref<2x128xf32, #tpu.memory_space<vmem>>, vector<2x32xf32>,
    return
  }
  func.func @transform_0(%arg0: i32) -> (i32, i32, i32) {
    %c0_i32 = arith.constant 0 : i32
    %c0_i32_0 = arith.constant 0 : i32
    %c0_i32_1 = arith.constant 0 : i32
    return %arg0, %c0_i32, %c0_i32_0 : i32, i32, i32
  }
  func.func @transform_1(%arg0: i32) -> (i32, i32) {
    %c0_i32 = arith.constant 0 : i32
    %c0_i32_0 = arith.constant 0 : i32
    %c0_i32_1 = arith.constant 0 : i32
    return %c0_i32, %c0_i32_0 : i32, i32
  }
  func.func @transform_2(%arg0: i32) -> (i32, i32) {
    %c0_i32 = arith.constant 0 : i32
    %c0_i32_0 = arith.constant 0 : i32
    %c0_i32_1 = arith.constant 0 : i32
    return %c0_i32, %c0_i32_0 : i32, i32
  }
  func.func @transform_3(%arg0: i32) -> (i32, i32) {
    %c0_i32 = arith.constant 0 : i32
    %c0_i32_0 = arith.constant 0 : i32
    %c0_i32_1 = arith.constant 0 : i32
    return %c0_i32, %c0_i32_0 : i32, i32
  }
  func.func @transform_4(%arg0: i32) -> (i32, i32) {
    %c0_i32 = arith.constant 0 : i32
    %c0_i32_0 = arith.constant 0 : i32
    %c0_i32_1 = arith.constant 0 : i32
    return %c0_i32, %c0_i32_0 : i32, i32
  }
  func.func @transform_5(%arg0: i32) -> (i32, i32) {
    %c0_i32 = arith.constant 0 : i32
    %c0_i32_0 = arith.constant 0 : i32
    %c0_i32_1 = arith.constant 0 : i32
    return %c0_i32, %c0_i32_0 : i32, i32
  }
  func.func @transform_6(%arg0: i32) -> (i32, i32) {
    %c0_i32 = arith.constant 0 : i32
    %c0_i32_0 = arith.constant 0 : i32
    %c0_i32_1 = arith.constant 0 : i32
    return %c0_i32, %c0_i32_0 : i32, i32
  }
  func.func @transform_7(%arg0: i32) -> (i32, i32) {
    %c0_i32 = arith.constant 0 : i32
    %c0_i32_0 = arith.constant 0 : i32
    %c0_i32_1 = arith.constant 0 : i32
    return %c0_i32, %c0_i32_0 : i32, i32
  }
  func.func @transform_8(%arg0: i32) -> (i32, i32) {
    %c0_i32 = arith.constant 0 : i32
    %c0_i32_0 = arith.constant 0 : i32
    return %arg0, %c0_i32 : i32, i32
  }
}

</mosaic_0001>

<bundles_post_ra>
// kernel: tpu_custom_call.1
= control target key start
LH: loop header
LB: loop body
LE: loop exit
PB: predicated region body
PF: predicated region fallthrough
CT: control target
= control target key end

     0   :  { %13 = vsyncpa [#allocation6], 0  ;;  %s3156_s0 = inlined_call_operand.hbm [shape: f32[2,8,32], index: 0, kind: input, shape index: {}]   ;;  %s3157_s1 = inlined_call_operand.hbm [shape: f32[32,128], index: 1, kind: input, shape index: {}]   ;;  %s3158_s2 = inlined_call_operand.hbm [shape: f32[32,128], index: 2, kind: input, shape index: {}]   ;;  %s3159_s3 = inlined_call_operand.hbm [shape: f32[32,128], index: 3, kind: input, shape index: {}]   ;;  %s3160_s4 = inlined_call_operand.vmem [shape: f32[1,128], index: 4, kind: input, shape index: {}]   ;;  %s3161_s5 = inlined_call_operand.hbm [shape: f32[32,128], index: 5, kind: input, shape index: {}]   ;;  %s3162_s6 = inlined_call_operand.hbm [shape: f32[32,128], index: 6, kind: input, shape index: {}]   ;;  %s3163_s7 = inlined_call_operand.vmem [shape: f32[1,128], index: 7, kind: input, shape index: {}]   ;;  %s3164_s8 = inlined_call_operand.hbm [shape: f32[2,128], index: 8, kind: output, shape index: {}]  }
   0x1   :  { %14 = vsyncpa [#allocation9], 0 }
   0x2   :  { %15 = vsyncpa [#allocation12], 0 }
   0x3   :  { %16 = vsyncpa [#allocation15], 0 }
   0x4   :  { %17 = vsyncpa [#allocation7], 0  ;;  %s2650_s27 = smov [#allocation8]   ;;  %s2651_s29 = smov [#allocation11]  }
   0x5   :  { %s35_s28 = sshll.u32 %s2650_s27, 4  ;;  %s59_s30 = sshll.u32 %s2651_s29, 4  ;;  %s36_s28 = int_to_ptr.vmem [resolvable:$true] %s35_s28  ;;  %s2712_s30 = int_to_ptr.vmem [resolvable:$true] %s59_s30 }
   0x6   :  { %s2486_s11 = scalar_lea.hbm %s3157_s1, 512 }
   0x7   :  { %p2487_p0 = scmp.ne.s32.totalorder %s3157_s1, %s2486_s11  ;;  %p2490_p1 = scmp.lt.u32.totalorder %s2486_s11, %s3157_s1 }
   0x9   :  { %p2492_p2 = pnand %p2490_p1, %p2487_p0 }
   0xb   :  { %2495 = shalt.err (!%p2492_p2)
}
   0xc   :  { %s2496_s16 = scalar_lea.vmem %s36_s28, 512  ;;  %p2501_p4 = scmp.lt.s32.totalorder %s36_s28, %s36_s28 }
   0xd   :  { %p2497_p3 = scmp.ne.s32.totalorder %s36_s28, %s2496_s16  ;;  %p2502_p5 = scmp.lt.s32.totalorder %s2496_s16, %s2496_s16 }
   0xf   :  { %p2503_p6 = por %p2502_p5, %p2501_p4 }
  0x11   :  { %p2504_p7 = pnand %p2503_p6, %p2497_p3 }
  0x13   :  { %2507 = shalt.err (!%p2504_p7)
}
  0x14   :  { %s2652_s17 = smov 128   ;;  %s2653_s18 = smov 8  }
  0x15   :  { %41 = dma.hbm_to_vmem [thread:$0]  %s3157_s1, 512, %s36_s28, [#allocation9], %s2652_s17, %s2652_s17, %s2653_s18  }
  0x16   :  { %s2508_s23 = scalar_lea.hbm %s3159_s3, 512 }
  0x17   :  { %p2509_p8 = scmp.ne.s32.totalorder %s3159_s3, %s2508_s23  ;;  %p2512_p9 = scmp.lt.u32.totalorder %s2508_s23, %s3159_s3 }
  0x19   :  { %p2514_p10 = pnand %p2512_p9, %p2509_p8 }
  0x1b   :  { %2517 = shalt.err (!%p2514_p10)
}
  0x1c   :  { %s2518_s29 = scalar_lea.vmem %s2712_s30, 512  ;;  %p2523_p12 = scmp.lt.s32.totalorder %s2712_s30, %s2712_s30 }
  0x1d   :  { %p2519_p11 = scmp.ne.s32.totalorder %s2712_s30, %s2518_s29  ;;  %p2524_p13 = scmp.lt.s32.totalorder %s2518_s29, %s2518_s29 }
  0x1f   :  { %p2525_p0 = por %p2524_p13, %p2523_p12 }
  0x21   :  { %p2526_p1 = pnand %p2525_p0, %p2519_p11 }
  0x23   :  { %2529 = shalt.err (!%p2526_p1)
}
  0x24   :  { %65 = dma.hbm_to_vmem [thread:$0]  %s3159_s3, 512, %s2712_s30, [#allocation12], %s2652_s17, %s2652_s17, %s2653_s18  }
  0x25   :  { %s2654_s9 = smov [#allocation5]   ;;  %s2655_s11 = smov [#allocation10]  }
  0x26   :  { %s23_s10 = sshll.u32 %s2654_s9, 4  ;;  %s47_s12 = sshll.u32 %s2655_s11, 4  ;;  %s24_s10 = int_to_ptr.vmem [resolvable:$true] %s23_s10  ;;  %s2749_s12 = int_to_ptr.vmem [resolvable:$true] %s47_s12 }
  0x27   :  { %s2530_s15 = scalar_lea.hbm %s3156_s0, 256 }
  0x28   :  { %p2531_p2 = scmp.ne.s32.totalorder %s3156_s0, %s2530_s15  ;;  %p2534_p3 = scmp.lt.u32.totalorder %s2530_s15, %s3156_s0 }
  0x2a   :  { %p2536_p4 = pnand %p2534_p3, %p2531_p2 }
  0x2c   :  { %2539 = shalt.err (!%p2536_p4)
}
  0x2d   :  { %s2540_s3 = scalar_lea.vmem %s24_s10, 256  ;;  %p2545_p6 = scmp.lt.s32.totalorder %s24_s10, %s24_s10 }
  0x2e   :  { %p2541_p5 = scmp.ne.s32.totalorder %s24_s10, %s2540_s3  ;;  %p2546_p7 = scmp.lt.s32.totalorder %s2540_s3, %s2540_s3 }
  0x30   :  { %p2547_p8 = por %p2546_p7, %p2545_p6 }
  0x32   :  { %p2548_p9 = pnand %p2547_p8, %p2541_p5 }
  0x34   :  { %2551 = shalt.err (!%p2548_p9)
}
  0x35   :  { %29 = dma.hbm_to_vmem [thread:$0]  %s3156_s0, 256, %s24_s10, [#allocation6], %s2652_s17, %s2652_s17, %s2653_s18  }
  0x36   :  { %s2552_s25 = scalar_lea.hbm %s3158_s2, 512 }
  0x37   :  { %p2553_p10 = scmp.ne.s32.totalorder %s3158_s2, %s2552_s25  ;;  %p2556_p11 = scmp.lt.u32.totalorder %s2552_s25, %s3158_s2 }
  0x39   :  { %p2558_p12 = pnand %p2556_p11, %p2553_p10 }
  0x3b   :  { %2561 = shalt.err (!%p2558_p12)
}
  0x3c   :  { %s2562_s28 = scalar_lea.vmem %s2749_s12, 512  ;;  %p2567_p0 = scmp.lt.s32.totalorder %s2749_s12, %s2749_s12 }
  0x3d   :  { %p2563_p13 = scmp.ne.s32.totalorder %s2749_s12, %s2562_s28  ;;  %p2568_p1 = scmp.lt.s32.totalorder %s2562_s28, %s2562_s28 }
  0x3f   :  { %p2569_p2 = por %p2568_p1, %p2567_p0 }
  0x41   :  { %p2570_p3 = pnand %p2569_p2, %p2563_p13 }
  0x43   :  { %2573 = shalt.err (!%p2570_p3)
}
  0x44   :  { %53 = dma.hbm_to_vmem [thread:$0]  %s3158_s2, 512, %s2749_s12, [#allocation9], %s2652_s17, %s2652_s17, %s2653_s18  }
  0x45   :  { %s2656_s10 = smov [#allocation13]   ;;  %s2657_s13 = smov [#allocation14]  }
  0x46   :  { %s73_s11 = sshll.u32 %s2656_s10, 4  ;;  %s85_s14 = sshll.u32 %s2657_s13, 4  ;;  %s74_s11 = int_to_ptr.vmem [resolvable:$true] %s73_s11  ;;  %s2786_s14 = int_to_ptr.vmem [resolvable:$true] %s85_s14 }
  0x47   :  { %s2574_s19 = scalar_lea.hbm %s3161_s5, 512 }
  0x48   :  { %p2575_p4 = scmp.ne.s32.totalorder %s3161_s5, %s2574_s19  ;;  %p2578_p5 = scmp.lt.u32.totalorder %s2574_s19, %s3161_s5 }
  0x4a   :  { %p2580_p6 = pnand %p2578_p5, %p2575_p4 }
  0x4c   :  { %2583 = shalt.err (!%p2580_p6)
}
  0x4d   :  { %s2584_s2 = scalar_lea.vmem %s74_s11, 512  ;;  %p2589_p8 = scmp.lt.s32.totalorder %s74_s11, %s74_s11 }
  0x4e   :  { %p2585_p7 = scmp.ne.s32.totalorder %s74_s11, %s2584_s2  ;;  %p2590_p9 = scmp.lt.s32.totalorder %s2584_s2, %s2584_s2 }
  0x50   :  { %p2591_p10 = por %p2590_p9, %p2589_p8 }
  0x52   :  { %p2592_p11 = pnand %p2591_p10, %p2585_p7 }
  0x54   :  { %2595 = shalt.err (!%p2592_p11)
}
  0x55   :  { %79 = dma.hbm_to_vmem [thread:$0]  %s3161_s5, 512, %s74_s11, [#allocation12], %s2652_s17, %s2652_s17, %s2653_s18  }
  0x56   :  { %s2596_s25 = scalar_lea.hbm %s3162_s6, 512 }
  0x57   :  { %p2597_p12 = scmp.ne.s32.totalorder %s3162_s6, %s2596_s25  ;;  %p2600_p13 = scmp.lt.u32.totalorder %s2596_s25, %s3162_s6 }
  0x59   :  { %p2602_p0 = pnand %p2600_p13, %p2597_p12 }
  0x5b   :  { %2605 = shalt.err (!%p2602_p0)
}
  0x5c   :  { %s2606_s28 = scalar_lea.vmem %s2786_s14, 512  ;;  %p2611_p2 = scmp.lt.s32.totalorder %s2786_s14, %s2786_s14 }
  0x5d   :  { %p2607_p1 = scmp.ne.s32.totalorder %s2786_s14, %s2606_s28  ;;  %p2612_p3 = scmp.lt.s32.totalorder %s2606_s28, %s2606_s28 }
  0x5f   :  { %p2613_p4 = por %p2612_p3, %p2611_p2 }
  0x61   :  { %p2614_p5 = pnand %p2613_p4, %p2607_p1 }
  0x63   :  { %2617 = shalt.err (!%p2614_p5)
}
  0x64   :  { %91 = dma.hbm_to_vmem [thread:$0]  %s3162_s6, 512, %s2786_s14, [#allocation15], %s2652_s17, %s2652_s17, %s2653_s18  }
  0x65   :  { %2640 = dma.done.wait [#allocation6], 256  }
  0x66   :  { %2641 = vsyncadd [#allocation6], 4294967040 }
  0x67   :  { %2642 = dma.done.wait [#allocation9], 1024  }
  0x68   :  { %2643 = vsyncadd [#allocation9], 4294966272 }
  0x69   :  { %2644 = dma.done.wait [#allocation12], 1024  }
  0x6a   :  { %2645 = vsyncadd [#allocation12], 4294966272 }
  0x6b   :  { %2646 = dma.done.wait [#allocation15], 512  }
  0x6c   :  { %2647 = vsyncadd [#allocation15], 4294966784  ;;  %vm112_vm0 = vcmask 254976   ;;  %v2658_v0 = vmov 0.0|0.0   ;;  %v2659_v1 = vmov 0.0   ;;  %vm2660_vm1 = vmmov 0  }
  0x6d   :  { %2305 = vmatprep.subr.bf16.mxu0 %v2658_v0  ;;  %2311 = vmatprep.subr.bf16.mxu1 %v2658_v0  ;;  %117 = vst.msk [vmem:[#allocation4] sm:$0x3] %vm112_vm0, %v2659_v1  ;;  %113 = vst.msk [vmem:[#allocation2] sm:$0x3] %vm112_vm0, %v2659_v1  ;;  %v127_v2 = vld [vmem:[#allocation10] sm:$0xff]  ;;  %v128_v3 = vld [vmem:[#allocation10 + $0x8] sm:$0xff] }
  0x6e   :  { %114 = vst.msk [vmem:[#allocation2 + $0x2] sm:$0x3] %vm112_vm0, %v2659_v1  ;;  %115 = vst.msk [vmem:[#allocation3] sm:$0x3] %vm112_vm0, %v2659_v1  ;;  %2148 = vmatprep.mubr.msk.f32.mxu0 %vm2660_vm1, %v2659_v1  ;;  %2159 = vmatprep.mubr.msk.f32.mxu1 %vm2660_vm1, %v2659_v1  ;;  %v122_v4 = vld [vmem:[#allocation8] sm:$0xff]  ;;  %v2839_v5 = vpack.c.bf16 %v128_v3, %v127_v2  ;;  %v123_v6 = vld [vmem:[#allocation8 + $0x8] sm:$0xff] }
  0x6f   :  { %116 = vst.msk [vmem:[#allocation3 + $0x2] sm:$0x3] %vm112_vm0, %v2659_v1  ;;  %v129_v7 = vld [vmem:[#allocation10 + $0x10] sm:$0xff]  ;;  %v130_v8 = vld [vmem:[#allocation10 + $0x18] sm:$0xff]  ;;  %v2841_v9 = vpack.c.bf16 %v123_v6, %v122_v4  ;;  %v278_v14 = vld [vmem:[#allocation11] sm:$0xff]  ;;  %vm131_vm2 = vcmask 261120  }
  0x70   :  { %v124_v10 = vld [vmem:[#allocation8 + $0x10] sm:$0xff]  ;;  %v125_v11 = vld [vmem:[#allocation8 + $0x18] sm:$0xff]  ;;  %2307 = vmatpush3.bf16.msra.mxu0 %v2839_v5  ;;  %v2844_v12 = vpack.c.bf16 %v130_v8, %v129_v7  ;;  %v279_v15 = vld [vmem:[#allocation11 + $0x8] sm:$0xff]  ;;  %s2661_s18 = smov 64   ;;  %s2662_s9 = smov 32   ;;  %vm662_vm3 = vcmask 1041409  }
  0x71   :  { %2313 = vmatpush3.bf16.msra.mxu1 %v2841_v9  ;;  %2308 = vmatprep.subr.bf16.mxu0 %v2658_v0  ;;  %v2848_v13 = vpack.c.bf16 %v125_v11, %v124_v10  ;;  %v2852_v17 = vpack.c.bf16 %v279_v15, %v278_v14  ;;  %v280_v19 = vld [vmem:[#allocation11 + $0x10] sm:$0xff]  ;;  %v281_v20 = vld [vmem:[#allocation11 + $0x18] sm:$0xff]  ;;  %v2875_v29 = vld [vmem:[%s3160_s4] ss:$0 sm:$0xff]  ;;  %vm665_vm4 = vcmask 58368   ;;  %vm2009_vm5 = vcmask 1041920  }
  0x72   :  { %2314 = vmatprep.subr.bf16.mxu1 %v2658_v0  ;;  %v2860_v21 = vpack.c.bf16 %v281_v20, %v280_v19  ;;  %v409_v45 = vld [vmem:[#allocation14] sm:$0xff]  ;;  %v410_v46 = vld [vmem:[#allocation14 + $0x8] sm:$0xff]  ;;  %v411_v50 = vld [vmem:[#allocation14 + $0x10] sm:$0xff]  ;;  %2010 = vst.msk [vmem:[#allocation16] sm:$0x3] %vm2009_vm5, %v2659_v1  ;;  %s2666_s11 = smov [#allocation16]  }
  0x73   :  { %v405_v47 = vld [vmem:[#allocation13] sm:$0xff]  ;;  %v2884_v48 = vpack.c.bf16 %v410_v46, %v409_v45  ;;  %v406_v49 = vld [vmem:[#allocation13 + $0x8] sm:$0xff]  ;;  %v412_v51 = vld [vmem:[#allocation14 + $0x18] sm:$0xff]  ;;  %s2026_s13 = sshll.u32 %s2666_s11, 4  ;;  %vm2018_vm6 = vcmask 517376   ;;  %s2027_s13 = int_to_ptr.vmem [resolvable:$true] %s2026_s13 }
  0x74   :  { %2310 = vmatpush3.bf16.msra.mxu0 %v2844_v12  ;;  %v126_v16 = vld [vmem:[#allocation4] sm:$0x3]  ;;  %v118_v22 = vld [vmem:[#allocation2] sm:$0x3]  ;;  %v2886_v52 = vpack.c.bf16 %v406_v49, %v405_v47  ;;  %v407_v53 = vld [vmem:[#allocation13 + $0x10] sm:$0xff]  ;;  %v2889_v55 = vpack.c.bf16 %v412_v51, %v411_v50  ;;  %s2618_s14 = scalar_lea.vmem %s2027_s13, 32  ;;  %p2623_p7 = scmp.lt.s32.totalorder %s2027_s13, %s2027_s13 }
  0x75   :  { %2316 = vmatpush3.bf16.msra.mxu1 %v2848_v13  ;;  %2317 = vmatprep.subr.bf16.mxu0 %v2658_v0  ;;  %v121_v18 = vld [vmem:[#allocation2 + $0x2] sm:$0x3]  ;;  %v119_v34 = vld [vmem:[#allocation3] sm:$0x3]  ;;  %v408_v54 = vld [vmem:[#allocation13 + $0x18] sm:$0xff]  ;;  %p2619_p6 = scmp.ne.s32.totalorder %s2027_s13, %s2618_s14  ;;  %p2624_p8 = scmp.lt.s32.totalorder %s2618_s14, %s2618_s14 }
  0x76   :  { %2323 = vmatprep.subr.bf16.mxu1 %v2658_v0  ;;  %v2893_v56 = vpack.c.bf16 %v408_v54, %v407_v53  ;;  %v402_v57 = vld [vmem:[#allocation2 + $0x2] sm:$0x3]  ;;  %v404_v61 = vld [vmem:[#allocation3 + $0x2] sm:$0x3]  ;;  %v2921_v4 = vld [vmem:[%s3163_s7] ss:$0 sm:$0xff] }
  0x77   :  { %2149 = vmatmul.mubr.msk.f32.vlgmr.msra.gmra.mrb[0].mxu0 %vm131_vm2, %v126_v16  ;;  %v2943_v45 = vld [vmem:[#allocation5 + $0x8] sm:$0xff]  ;;  %s2665_s7 = smov 96   ;;  %p2625_p9 = por %p2624_p8, %p2623_p7 }
  0x78   :  { %2160 = vmatmul.mubr.msk.f32.vlgmr.msra.gmra.mrb[0].mxu1 %vm131_vm2, %v121_v18  ;;  %2319 = vmatpush3.bf16.msra.mxu0 %v2852_v17 }
  0x79   :  { %2320 = vmatprep.subr.bf16.mxu0 %v2658_v0  ;;  %2170 = vmatprep.mubr.msk.f32.mxu0 %vm2660_vm1, %v2659_v1  ;;  %p2626_p10 = pnand %p2625_p9, %p2619_p6 }
  0x7a   :  { %2181 = vmatprep.mubr.msk.f32.mxu1 %vm2660_vm1, %v2659_v1  ;;  %2325 = vmatpush3.bf16.msra.mxu1 %v2884_v48 }
  0x7b   :  { %2326 = vmatprep.subr.bf16.mxu1 %v2658_v0 }
  0x7c   :  { %2322 = vmatpush3.bf16.msra.mxu0 %v2860_v21 }
  0x7d   :  { %2329 = vmatprep.subr.bf16.mxu0 %v2658_v0 }
  0x7e   :  { %2328 = vmatpush3.bf16.msra.mxu1 %v2889_v55 }
  0x7f   :  { %2171 = vmatmul.mubr.msk.f32.vlgmr.msra.gmra.mrb[2].mxu0 %vm131_vm2, %v118_v22  ;;  %2335 = vmatprep.subr.bf16.mxu1 %v2658_v0 }
  0x80   :  { %2192 = vmatprep.mubr.msk.f32.mxu0 %vm2660_vm1, %v2659_v1  ;;  %2331 = vmatpush3.bf16.msra.mxu0 %v2886_v52 }
  0x81   :  { %2332 = vmatprep.subr.bf16.mxu0 %v2658_v0  ;;  %2182 = vmatmul.mubr.msk.f32.vlgmr.msra.gmra.mrb[2].mxu1 %vm131_vm2, %v402_v57 }
  0x82   :  { %2337 = vmatpush3.bf16.msra.mxu1 %v2839_v5  ;;  %2203 = vmatprep.mubr.msk.f32.mxu1 %vm2660_vm1, %v2659_v1 }
  0x83   :  { %2338 = vmatprep.subr.bf16.mxu1 %v2658_v0 }
  0x84   :  { %2334 = vmatpush3.bf16.msra.mxu0 %v2893_v56 }
  0x85   :  { %2341 = vmatprep.subr.bf16.mxu0 %v2658_v0 }
  0x86   :  { %2340 = vmatpush3.bf16.msra.mxu1 %v2844_v12 }
  0x87   :  { %2347 = vmatprep.subr.bf16.mxu1 %v2658_v0 }
 0x14a   :  { %v201_v23 = vpop.f32.mrb[0].mxu0 }
 0x14b   :  { %v2150_v24 = vpop.f32.mrb[1].mxu0  ;;  %v274_v25 = vpop.f32.mrb[0].mxu1 }
 0x14c   :  { %v275_v26 = vadd.f32 %v274_v25, %v201_v23  ;;  %v2161_v27 = vpop.f32.mrb[1].mxu1 }
 0x152   :  { %v351_v28 = vpop.f32.mrb[2].mxu0 }
 0x153   :  { %v355_v30 = vadd.f32 %v351_v28, %v275_v26  ;;  %v2172_v31 = vpop.f32.mrb[3].mxu0  ;;  %v2663_v26 = vmov 1966171168   ;;  %v609_v28 = vlaneseq }
 0x154   :  { %v482_v62 = vpop.f32.mrb[2].mxu1  ;;  %v607_v27 = vunpack.c.l.s4 %v2663_v26 }
 0x155   :  { %v363_v32 = vadd.f32 %v2875_v29, %v355_v30  ;;  %v2183_v63 = vpop.f32.mrb[3].mxu1  ;;  %v610_v31 = vshrl.u32 %v609_v28, 7  ;;  %v653_v53 = vand.u32 127, %v609_v28 }
 0x156   :  { %v608_v30 = vunpack.c.0.s8 %v607_v27  ;;  %v2664_v63 = vmov 0  }
 0x157   :  { %2414 = vtanh.f32 %v363_v32  ;;  %v2042_v35 = vmul.f32 -1.442695, %v363_v32  ;;  %v2949_v54 = vsub.s32 %v653_v53, %v610_v31  ;;  %2413 = vset.pattern.permute.xlu0 %v2664_v63  ;;  %2412 = vset.pattern.permute.xlu1 %v2664_v63 }
 0x158   :  { %v2930_v32 = vsub.s32 %v608_v30, %v610_v31 }
 0x159   :  { %2416 = vpow2.f32 %v2042_v35  ;;  %v2932_v35 = vsub.s32 0, %v610_v31 }
 0x161   :  { %v2415_v33 = vpop.eup %2414 }
 0x162   :  { %377 = vrot.lane.b32.xlu0 %v2415_v33, %s2661_s18 }
 0x163   :  { %v2417_v36 = vpop.eup %2416 }
 0x164   :  { %v367_v37 = vadd.f32 1.0, %v2417_v36 }
 0x166   :  { %372 = vrot.lane.b32.xlu0 %v119_v34, %s2662_s9  ;;  %2418 = vrcp.f32 %v367_v37 }
 0x170   :  { %v2419_v38 = vpop.eup %2418 }
 0x1d4   :  { %v378_v39 = vpop.permute.xlu0 %377 }
 0x1d5   :  { %v380_v40 = vmul.f32 %v2419_v38, %v378_v39 }
 0x1d7   :  { %382 = vrot.lane.b32.xlu1 %v380_v40, %s2662_s9 }
 0x1d8   :  { %v373_v41 = vpop.permute.xlu0 %372 }
 0x1d9   :  { %v375_v42 = vmul.f32 %v2419_v38, %v373_v41 }
 0x249   :  { %v383_v43 = vpop.permute.xlu1 %382 }
 0x24a   :  { %v2881_v44 = vadd.f32 %v383_v43, %v375_v42  ;;  %v2941_v42 = vld [vmem:[#allocation5] sm:$0xff] }
 0x24c   :  { %2420 = vtanh.f32 %v2881_v44 }
 0x256   :  { %v2421_v58 = vpop.eup %2420 }
 0x257   :  { %388 = vrot.lane.b32.xlu1 %v2421_v58, %s2661_s18 }
 0x2c9   :  { %v389_v59 = vpop.permute.xlu1 %388 }
 0x2ca   :  { %v391_v60 = vmul.f32 %v2419_v38, %v389_v59 }
 0x2cc   :  { %398 = vrot.lane.b32.xlu0 %v391_v60, %s2662_s9 }
 0x2d0   :  { %574 = vrot.lane.b32.xlu0 %v404_v61, %s2662_s9 }
 0x33e   :  { %v399_v2 = vpop.permute.xlu0 %398 }
 0x33f   :  { %401 = vst.msk [vmem:[#allocation2] sm:$0x3] %vm112_vm0, %v399_v2  ;;  %2193 = vmatmul.mubr.msk.f32.vlgmr.msra.gmra.mrb[4].mxu0 %vm131_vm2, %v399_v2  ;;  %v2955_v2 = vsub.s32 1, %v610_v31 }
 0x340   :  { %2343 = vmatpush3.bf16.msra.mxu0 %v2841_v9  ;;  %2214 = vmatprep.mubr.msk.f32.mxu0 %vm2660_vm1, %v2659_v1 }
 0x341   :  { %2344 = vmatprep.subr.bf16.mxu0 %v2658_v0 }
 0x342   :  { %v575_v20 = vpop.permute.xlu0 %574 }
 0x344   :  { %2346 = vmatpush3.bf16.msra.mxu0 %v2848_v13 }
 0x345   :  { %2353 = vmatprep.subr.bf16.mxu0 %v2658_v0 }
 0x412   :  { %v554_v3 = vpop.f32.mrb[4].mxu0 }
 0x413   :  { %v555_v6 = vadd.f32 %v554_v3, %v482_v62  ;;  %v2194_v7 = vpop.f32.mrb[5].mxu0 }
 0x415   :  { %v565_v8 = vadd.f32 %v2921_v4, %v555_v6 }
 0x417   :  { %2422 = vtanh.f32 %v565_v8  ;;  %v2046_v11 = vmul.f32 -1.442695, %v565_v8 }
 0x419   :  { %2424 = vpow2.f32 %v2046_v11 }
 0x421   :  { %v2423_v10 = vpop.eup %2422 }
 0x422   :  { %579 = vrot.lane.b32.xlu1 %v2423_v10, %s2661_s18 }
 0x423   :  { %v2425_v14 = vpop.eup %2424 }
 0x424   :  { %v569_v15 = vadd.f32 1.0, %v2425_v14 }
 0x426   :  { %2426 = vrcp.f32 %v569_v15 }
 0x430   :  { %v2427_v16 = vpop.eup %2426 }
 0x431   :  { %v577_v22 = vmul.f32 %v2427_v16, %v575_v20 }
 0x494   :  { %v580_v18 = vpop.permute.xlu1 %579 }
 0x495   :  { %v582_v19 = vmul.f32 %v2427_v16, %v580_v18 }
 0x497   :  { %584 = vrot.lane.b32.xlu1 %v582_v19, %s2662_s9 }
 0x509   :  { %v585_v23 = vpop.permute.xlu1 %584 }
 0x50a   :  { %v2926_v24 = vadd.f32 %v585_v23, %v577_v22 }
 0x50c   :  { %2428 = vtanh.f32 %v2926_v24 }
 0x516   :  { %v2429_v25 = vpop.eup %2428 }
 0x517   :  { %590 = vrot.lane.b32.xlu0 %v2429_v25, %s2661_s18 }
 0x589   :  { %v591_v33 = vpop.permute.xlu0 %590 }
 0x58a   :  { %v593_v34 = vmul.f32 %v2427_v16, %v591_v33 }
 0x58c   :  { %v612_v36 = vrot.slane %v593_v34, %v2930_v32 }
 0x58e   :  { %v613_v37 = vcombine.high %v612_v36, %v612_v36  ;;  %v620_v38 = vrot.slane %v612_v36, %v2930_v32 }
 0x590   :  { %v631_v39 = vrot.slane %v620_v38, %v2932_v35  ;;  %v627_v40 = vrot.slane %v613_v37, %v2930_v32 }
 0x592   :  { %636 = vrot.lane.b32.xlu1 %v631_v39, %s2662_s9  ;;  %v635_v41 = vrot.slane %v627_v40, %v2932_v35 }
 0x594   :  { %638 = vrot.lane.b32.xlu0 %v635_v41, %s2662_s9 }
 0x604   :  { %v637_v43 = vpop.permute.xlu1 %636 }
 0x605   :  { %v642_v46 = vmul.f32 %v637_v43, %v2941_v42 }
 0x606   :  { %v639_v47 = vpop.permute.xlu0 %638 }
 0x607   :  { %v643_v49 = vmul.f32 %v639_v47, %v2943_v45  ;;  %v644_v50 = vsel %vm131_vm2, %v642_v46, 0.0 }
 0x608   :  { %645 = vadd.xlane.f32.xlu1 %v644_v50 }
 0x609   :  { %v647_v51 = vsel %vm131_vm2, %v643_v49, 0.0 }
 0x60a   :  { %648 = vadd.xlane.f32.xlu0 %v647_v51 }
 0x695   :  { %v646_v57 = vpop.xlane.xlu1 %645 }
 0x696   :  { %v657_v59 = vrot.slane %v646_v57, %v2949_v54 }
 0x697   :  { %v649_v58 = vpop.xlane.xlu0 %648 }
 0x698   :  { %v661_v60 = vrot.slane %v649_v58, %v2949_v54 }
 0x69a   :  { %v663_v61 = vsel %vm662_vm3, %v661_v60, %v657_v59 }
 0x69b   :  { %v666_v62 = vsel %vm665_vm4, %v663_v61, -inf }
 0x69c   :  { %667 = vmax.xlane.f32.xlu0 %v666_v62 }
 0x729   :  { %v668_v3 = vpop.xlane.xlu0 %667 }
 0x72a   :  { %v673_v6 = vrot.slane %v668_v3, %v2932_v35  ;;  %v677_v7 = vrot.slane %v668_v3, %v2955_v2 }
 0x72c   :  { %v680_v8 = vsub.f32 %v646_v57, %v673_v6  ;;  %v681_v10 = vsub.f32 %v649_v58, %v677_v7  ;;  %v753_v6 = vld [vmem:[#allocation2] sm:$0x3] }
 0x72e   :  { %v682_v11 = vmul.f32 1.442695, %v680_v8  ;;  %v684_v14 = vmul.f32 1.442695, %v681_v10 }
 0x730   :  { %2430 = vpow2.f32 %v682_v11 }
 0x731   :  { %2432 = vpow2.f32 %v684_v14 }
 0x73a   :  { %v2431_v15 = vpop.eup %2430 }
 0x73b   :  { %v2433_v16 = vpop.eup %2432  ;;  %689 = vperm.xlu1 %2412, %v2431_v15  }
 0x73c   :  { %692 = vperm.xlu0 %2413, %v2433_v16  }
 0x7ba   :  { %v690_v18 = vpop.permute.xlu1 %689 }
 0x7bb   :  { %v693_v19 = vpop.permute.xlu0 %692  ;;  %v697_v20 = vrot.slane %v690_v18, %v2949_v54 }
 0x7bc   :  { %v701_v22 = vrot.slane %v693_v19, %v2949_v54 }
 0x7be   :  { %v702_v23 = vsel %vm662_vm3, %v701_v22, %v697_v20 }
 0x7bf   :  { %v704_v25 = vsel %vm665_vm4, %v702_v23, 0.0 }
 0x7c0   :  { %705 = vadd.xlane.f32.xlu1 %v704_v25 }
 0x7d1   :  { %600 = vrot.lane.b32.xlu1 %v593_v34, %s2662_s9 }
 0x84d   :  { %v706_v26 = vpop.xlane.xlu1 %705 }
 0x84e   :  { %v711_v27 = vrot.slane %v706_v26, %v2932_v35  ;;  %v715_v28 = vrot.slane %v706_v26, %v2955_v2 }
 0x850   :  { %2434 = vrcp.f32 %v711_v27 }
 0x851   :  { %v601_v30 = vpop.permute.xlu1 %600  ;;  %2436 = vrcp.f32 %v715_v28 }
 0x852   :  { %603 = vst.msk [vmem:[#allocation2 + $0x2] sm:$0x3] %vm112_vm0, %v601_v30 }
 0x859   :  { %v755_v31 = vld [vmem:[#allocation2 + $0x2] sm:$0x3] }
 0x85a   :  { %v2435_v33 = vpop.eup %2434  ;;  %2215 = vmatmul.mubr.msk.f32.vlgmr.msra.gmra.mrb[6].mxu0 %vm131_vm2, %v755_v31  ;;  %v1035_v38 = vld [vmem:[#allocation2 + $0x2] sm:$0x3] }
 0x85b   :  { %2355 = vmatpush3.bf16.msra.mxu0 %v2884_v48  ;;  %v719_v36 = vmul.f32 %v2435_v33, %v2431_v15  ;;  %2236 = vmatprep.mubr.msk.f32.mxu0 %vm2660_vm1, %v2659_v1  ;;  %v2437_v34 = vpop.eup %2436 }
 0x85c   :  { %2356 = vmatprep.subr.bf16.mxu0 %v2658_v0  ;;  %v721_v37 = vmul.f32 %v2437_v34, %v2433_v16 }
 0x85d   :  { %724 = vperm.xlu0 %2413, %v719_v36  }
 0x85f   :  { %2358 = vmatpush3.bf16.msra.mxu0 %v2889_v55 }
 0x860   :  { %2365 = vmatprep.subr.bf16.mxu0 %v2658_v0 }
 0x861   :  { %729 = vperm.xlu0 %2413, %v721_v37  }
 0x862   :  { %2237 = vmatmul.mubr.msk.f32.vlgmr.msra.gmra.mrb[8].mxu0 %vm131_vm2, %v1035_v38 }
 0x863   :  { %2367 = vmatpush3.bf16.msra.mxu0 %v2839_v5  ;;  %2258 = vmatprep.mubr.msk.f32.mxu0 %vm2660_vm1, %v2659_v1 }
 0x864   :  { %2368 = vmatprep.subr.bf16.mxu0 %v2658_v0 }
 0x865   :  { %393 = vrot.lane.b32.xlu0 %v2881_v44, %s2665_s7 }
 0x867   :  { %2370 = vmatpush3.bf16.msra.mxu0 %v2844_v12 }
 0x868   :  { %2377 = vmatprep.subr.bf16.mxu0 %v2658_v0 }
 0x8dc   :  { %v725_v39 = vpop.permute.xlu0 %724 }
 0x8dd   :  { %v732_v40 = vmul.f32 %v725_v39, %v2941_v42 }
 0x8df   :  { %v734_v41 = vsel %vm131_vm2, %v732_v40, 0.0 }
 0x8e0   :  { %v735_v43 = vrot.slane %v734_v41, 4  ;;  %v730_v5 = vpop.permute.xlu0 %729 }
 0x8e1   :  { %v733_v46 = vmul.f32 %v730_v5, %v2943_v45 }
 0x8e2   :  { %v736_v47 = vadd.f32 %v735_v43, %v734_v41 }
 0x8e3   :  { %v741_v49 = vsel %vm131_vm2, %v733_v46, 0.0 }
 0x8e4   :  { %v737_v50 = vrot.slane %v736_v47, 2  ;;  %v742_v51 = vrot.slane %v741_v49, 4  ;;  %v394_v53 = vpop.permute.xlu0 %393 }
 0x8e5   :  { %396 = vst.msk [vmem:[#allocation3] sm:$0x3] %vm112_vm0, %v394_v53 }
 0x8e6   :  { %v738_v12 = vadd.f32 %v737_v50, %v736_v47  ;;  %v743_v44 = vadd.f32 %v742_v51, %v741_v49 }
 0x8e8   :  { %v744_v57 = vrot.slane %v743_v44, 2  ;;  %v739_v58 = vrot.slane %v738_v12, 1 }
 0x8ea   :  { %v745_v59 = vadd.f32 %v744_v57, %v743_v44  ;;  %v740_v61 = vadd.f32 %v739_v58, %v738_v12 }
 0x8ec   :  { %v746_v60 = vrot.slane %v745_v59, 1  ;;  %v754_v25 = vld [vmem:[#allocation3] sm:$0x3] }
 0x8ee   :  { %v747_v62 = vadd.f32 %v746_v60, %v745_v59 }
 0x8f0   :  { %v750_v63 = vsel %vm662_vm3, %v747_v62, %v740_v61 }
 0x8f1   :  { %752 = vst.msk [vmem:[#allocation4] sm:$0x3] %vm112_vm0, %v750_v63 }
 0x8f8   :  { %v760_v3 = vld [vmem:[#allocation4] sm:$0x3] }
 0x8f9   :  { %2204 = vmatmul.mubr.msk.f32.vlgmr.msra.gmra.mrb[4].mxu1 %vm131_vm2, %v760_v3 }
 0x8fa   :  { %2349 = vmatpush3.bf16.msra.mxu1 %v2852_v17  ;;  %2225 = vmatprep.mubr.msk.f32.mxu1 %vm2660_vm1, %v2659_v1 }
 0x8fb   :  { %2350 = vmatprep.subr.bf16.mxu1 %v2658_v0 }
 0x8fe   :  { %2352 = vmatpush3.bf16.msra.mxu1 %v2860_v21 }
 0x8ff   :  { %2359 = vmatprep.subr.bf16.mxu1 %v2658_v0 }
 0x901   :  { %2226 = vmatmul.mubr.msk.f32.vlgmr.msra.gmra.mrb[6].mxu1 %vm131_vm2, %v753_v6 }
 0x902   :  { %2361 = vmatpush3.bf16.msra.mxu1 %v2886_v52  ;;  %2247 = vmatprep.mubr.msk.f32.mxu1 %vm2660_vm1, %v2659_v1 }
 0x903   :  { %2362 = vmatprep.subr.bf16.mxu1 %v2658_v0 }
 0x906   :  { %2364 = vmatpush3.bf16.msra.mxu1 %v2893_v56 }
 0x907   :  { %2371 = vmatprep.subr.bf16.mxu1 %v2658_v0 }
 0x92d   :  { %v907_v7 = vpop.f32.mrb[6].mxu0 }
 0x92e   :  { %v2216_v8 = vpop.f32.mrb[7].mxu0 }
 0x935   :  { %v1114_v10 = vpop.f32.mrb[8].mxu0 }
 0x936   :  { %v2238_v11 = vpop.f32.mrb[9].mxu0 }
 0x9cc   :  { %v834_v14 = vpop.f32.mrb[4].mxu1 }
 0x9cd   :  { %v908_v15 = vadd.f32 %v907_v7, %v834_v14  ;;  %v2205_v16 = vpop.f32.mrb[5].mxu1 }
 0x9d4   :  { %v984_v18 = vpop.f32.mrb[6].mxu1 }
 0x9d5   :  { %v988_v19 = vadd.f32 %v984_v18, %v908_v15  ;;  %v2227_v20 = vpop.f32.mrb[7].mxu1 }
 0x9d7   :  { %v996_v22 = vadd.f32 %v2875_v29, %v988_v19 }
 0x9d9   :  { %2438 = vtanh.f32 %v996_v22  ;;  %v2051_v26 = vmul.f32 -1.442695, %v996_v22 }
 0x9db   :  { %2440 = vpow2.f32 %v2051_v26 }
 0x9e3   :  { %v2439_v23 = vpop.eup %2438 }
 0x9e4   :  { %1010 = vrot.lane.b32.xlu0 %v2439_v23, %s2661_s18 }
 0x9e5   :  { %v2441_v27 = vpop.eup %2440 }
 0x9e6   :  { %v1000_v28 = vadd.f32 1.0, %v2441_v27 }
 0x9e8   :  { %1005 = vrot.lane.b32.xlu0 %v754_v25, %s2662_s9  ;;  %2442 = vrcp.f32 %v1000_v28 }
 0x9f2   :  { %v2443_v30 = vpop.eup %2442 }
 0xa56   :  { %v1011_v31 = vpop.permute.xlu0 %1010 }
 0xa57   :  { %v1013_v33 = vmul.f32 %v2443_v30, %v1011_v31 }
 0xa59   :  { %1015 = vrot.lane.b32.xlu0 %v1013_v33, %s2662_s9 }
 0xa5a   :  { %v1006_v36 = vpop.permute.xlu0 %1005 }
 0xa5b   :  { %v1008_v34 = vmul.f32 %v2443_v30, %v1006_v36 }
 0xacb   :  { %v1016_v37 = vpop.permute.xlu0 %1015 }
 0xacc   :  { %v3008_v38 = vadd.f32 %v1016_v37, %v1008_v34 }
 0xace   :  { %2444 = vtanh.f32 %v3008_v38 }
 0xad8   :  { %v2445_v39 = vpop.eup %2444 }
 0xad9   :  { %1021 = vrot.lane.b32.xlu1 %v2445_v39, %s2661_s18 }
 0xadd   :  { %595 = vrot.lane.b32.xlu1 %v2926_v24, %s2665_s7 }
 0xb4b   :  { %v1022_v40 = vpop.permute.xlu1 %1021 }
 0xb4c   :  { %v1024_v41 = vmul.f32 %v2443_v30, %v1022_v40 }
 0xb4e   :  { %1031 = vrot.lane.b32.xlu0 %v1024_v41, %s2662_s9 }
 0xb4f   :  { %v596_v43 = vpop.permute.xlu1 %595 }
 0xb50   :  { %598 = vst.msk [vmem:[#allocation3 + $0x2] sm:$0x3] %vm112_vm0, %v596_v43 }
 0xb57   :  { %v1036_v5 = vld [vmem:[#allocation3 + $0x2] sm:$0x3] }
 0xb58   :  { %1206 = vrot.lane.b32.xlu1 %v1036_v5, %s2662_s9 }
 0xbc0   :  { %v1032_v46 = vpop.permute.xlu0 %1031 }
 0xbc1   :  { %1034 = vst.msk [vmem:[#allocation2] sm:$0x3] %vm112_vm0, %v1032_v46  ;;  %2248 = vmatmul.mubr.msk.f32.vlgmr.msra.gmra.mrb[8].mxu1 %vm131_vm2, %v1032_v46 }
 0xbc2   :  { %2373 = vmatpush3.bf16.msra.mxu1 %v2841_v9  ;;  %2269 = vmatprep.mubr.msk.f32.mxu1 %vm2660_vm1, %v2659_v1 }
 0xbc3   :  { %2374 = vmatprep.subr.bf16.mxu1 %v2658_v0 }
 0xbc6   :  { %2376 = vmatpush3.bf16.msra.mxu1 %v2848_v13 }
 0xbc7   :  { %2383 = vmatprep.subr.bf16.mxu1 %v2658_v0 }
 0xbca   :  { %v1207_v13 = vpop.permute.xlu1 %1206 }
 0xc94   :  { %v1186_v24 = vpop.f32.mrb[8].mxu1 }
 0xc95   :  { %v1187_v47 = vadd.f32 %v1186_v24, %v1114_v10  ;;  %v2249_v49 = vpop.f32.mrb[9].mxu1 }
 0xc97   :  { %v1197_v50 = vadd.f32 %v2921_v4, %v1187_v47 }
 0xc99   :  { %2446 = vtanh.f32 %v1197_v50  ;;  %v2055_v53 = vmul.f32 -1.442695, %v1197_v50 }
 0xc9b   :  { %2448 = vpow2.f32 %v2055_v53 }
 0xca3   :  { %v2447_v51 = vpop.eup %2446 }
 0xca4   :  { %1211 = vrot.lane.b32.xlu0 %v2447_v51, %s2661_s18 }
 0xca5   :  { %v2449_v9 = vpop.eup %2448 }
 0xca6   :  { %v1201_v12 = vadd.f32 1.0, %v2449_v9 }
 0xca8   :  { %2450 = vrcp.f32 %v1201_v12 }
 0xcb2   :  { %v2451_v44 = vpop.eup %2450 }
 0xcb3   :  { %v1209_v59 = vmul.f32 %v2451_v44, %v1207_v13 }
 0xd16   :  { %v1212_v57 = vpop.permute.xlu0 %1211 }
 0xd17   :  { %v1214_v58 = vmul.f32 %v2451_v44, %v1212_v57 }
 0xd19   :  { %1216 = vrot.lane.b32.xlu0 %v1214_v58, %s2662_s9 }
 0xd8b   :  { %v1217_v60 = vpop.permute.xlu0 %1216 }
 0xd8c   :  { %v1219_v61 = vadd.f32 %v1217_v60, %v1209_v59 }
 0xd8e   :  { %2452 = vtanh.f32 %v1219_v61 }
 0xd98   :  { %v2453_v62 = vpop.eup %2452 }
 0xd99   :  { %1222 = vrot.lane.b32.xlu1 %v2453_v62, %s2661_s18 }
 0xe0b   :  { %v1223_v63 = vpop.permute.xlu1 %1222 }
 0xe0c   :  { %v1225_v3 = vmul.f32 %v2451_v44, %v1223_v63 }
 0xe0e   :  { %v1244_v6 = vrot.slane %v1225_v3, %v2930_v32 }
 0xe10   :  { %v1245_v7 = vcombine.high %v1244_v6, %v1244_v6  ;;  %v1252_v8 = vrot.slane %v1244_v6, %v2930_v32 }
 0xe12   :  { %v1263_v10 = vrot.slane %v1252_v8, %v2932_v35  ;;  %v1259_v11 = vrot.slane %v1245_v7, %v2930_v32 }
 0xe14   :  { %1268 = vrot.lane.b32.xlu0 %v1263_v10, %s2662_s9  ;;  %v1267_v14 = vrot.slane %v1259_v11, %v2932_v35 }
 0xe16   :  { %1270 = vrot.lane.b32.xlu1 %v1267_v14, %s2662_s9 }
 0xe86   :  { %v1269_v15 = vpop.permute.xlu0 %1268 }
 0xe87   :  { %v1274_v16 = vmul.f32 %v1269_v15, %v2941_v42 }
 0xe88   :  { %v1271_v18 = vpop.permute.xlu1 %1270 }
 0xe89   :  { %v1275_v19 = vmul.f32 %v1271_v18, %v2943_v45  ;;  %v1276_v20 = vsel %vm131_vm2, %v1274_v16, 0.0 }
 0xe8a   :  { %1277 = vadd.xlane.f32.xlu0 %v1276_v20 }
 0xe8b   :  { %v1279_v22 = vsel %vm131_vm2, %v1275_v19, 0.0 }
 0xe8c   :  { %1280 = vadd.xlane.f32.xlu1 %v1279_v22 }
 0xf17   :  { %v1278_v23 = vpop.xlane.xlu0 %1277 }
 0xf18   :  { %v1287_v26 = vrot.slane %v1278_v23, %v2949_v54 }
 0xf19   :  { %v1281_v25 = vpop.xlane.xlu1 %1280 }
 0xf1a   :  { %v1291_v27 = vrot.slane %v1281_v25, %v2949_v54 }
 0xf1c   :  { %v1292_v28 = vsel %vm662_vm3, %v1291_v27, %v1287_v26 }
 0xf1d   :  { %v1294_v30 = vsel %vm665_vm4, %v1292_v28, -inf }
 0xf1e   :  { %1295 = vmax.xlane.f32.xlu0 %v1294_v30 }
 0xfab   :  { %v1296_v31 = vpop.xlane.xlu0 %1295 }
 0xfac   :  { %v1301_v33 = vrot.slane %v1296_v31, %v2932_v35  ;;  %v1305_v36 = vrot.slane %v1296_v31, %v2955_v2 }
 0xfae   :  { %v1308_v34 = vsub.f32 %v1278_v23, %v1301_v33  ;;  %v1309_v37 = vsub.f32 %v1281_v25, %v1305_v36 }
 0xfb0   :  { %v1310_v39 = vmul.f32 1.442695, %v1308_v34  ;;  %v1312_v40 = vmul.f32 1.442695, %v1309_v37 }
 0xfb2   :  { %2454 = vpow2.f32 %v1310_v39 }
 0xfb3   :  { %2456 = vpow2.f32 %v1312_v40 }
 0xfbc   :  { %v2455_v41 = vpop.eup %2454 }
 0xfbd   :  { %v2457_v43 = vpop.eup %2456  ;;  %1317 = vperm.xlu0 %2413, %v2455_v41  }
 0xfbe   :  { %1320 = vperm.xlu1 %2412, %v2457_v43  }
0x103c   :  { %v1318_v5 = vpop.permute.xlu0 %1317 }
0x103d   :  { %v1321_v46 = vpop.permute.xlu1 %1320  ;;  %v1325_v24 = vrot.slane %v1318_v5, %v2949_v54 }
0x103e   :  { %v1329_v47 = vrot.slane %v1321_v46, %v2949_v54 }
0x1040   :  { %v1330_v49 = vsel %vm662_vm3, %v1329_v47, %v1325_v24 }
0x1041   :  { %v1332_v50 = vsel %vm665_vm4, %v1330_v49, 0.0 }
0x1042   :  { %1333 = vadd.xlane.f32.xlu1 %v1332_v50 }
0x1053   :  { %1227 = vrot.lane.b32.xlu1 %v1219_v61, %s2665_s7 }
0x10cf   :  { %v1334_v51 = vpop.xlane.xlu1 %1333 }
0x10d0   :  { %v1339_v53 = vrot.slane %v1334_v51, %v2932_v35  ;;  %v1343_v9 = vrot.slane %v1334_v51, %v2955_v2 }
0x10d2   :  { %2458 = vrcp.f32 %v1339_v53 }
0x10d3   :  { %v1228_v12 = vpop.permute.xlu1 %1227  ;;  %2460 = vrcp.f32 %v1343_v9 }
0x10d4   :  { %1230 = vst.msk [vmem:[#allocation3 + $0x2] sm:$0x3] %vm112_vm0, %v1228_v12 }
0x10dc   :  { %v2459_v44 = vpop.eup %2458 }
0x10dd   :  { %v1347_v57 = vmul.f32 %v2459_v44, %v2455_v41  ;;  %v2461_v58 = vpop.eup %2460 }
0x10de   :  { %v1349_v13 = vmul.f32 %v2461_v58, %v2457_v43 }
0x10df   :  { %1352 = vperm.xlu0 %2413, %v1347_v57  }
0x10e3   :  { %1357 = vperm.xlu0 %2413, %v1349_v13  }
0x10e7   :  { %1232 = vrot.lane.b32.xlu0 %v1225_v3, %s2662_s9 }
0x10eb   :  { %1026 = vrot.lane.b32.xlu0 %v3008_v38, %s2665_s7 }
0x115e   :  { %v1353_v59 = vpop.permute.xlu0 %1352 }
0x115f   :  { %v1360_v60 = vmul.f32 %v1353_v59, %v2941_v42 }
0x1161   :  { %v1362_v61 = vsel %vm131_vm2, %v1360_v60, 0.0  ;;  %v1664_v60 = vld [vmem:[#allocation3 + $0x2] sm:$0x3] }
0x1162   :  { %v1363_v62 = vrot.slane %v1362_v61, 4  ;;  %v1358_v63 = vpop.permute.xlu0 %1357 }
0x1163   :  { %v1361_v6 = vmul.f32 %v1358_v63, %v2943_v45 }
0x1164   :  { %v1364_v7 = vadd.f32 %v1363_v62, %v1362_v61 }
0x1165   :  { %v1369_v8 = vsel %vm131_vm2, %v1361_v6, 0.0 }
0x1166   :  { %v1365_v10 = vrot.slane %v1364_v7, 2  ;;  %v1370_v11 = vrot.slane %v1369_v8, 4  ;;  %v1233_v14 = vpop.permute.xlu0 %1232 }
0x1167   :  { %1235 = vst.msk [vmem:[#allocation2 + $0x2] sm:$0x3] %vm112_vm0, %v1233_v14 }
0x1168   :  { %v1366_v3 = vadd.f32 %v1365_v10, %v1364_v7  ;;  %v1371_v15 = vadd.f32 %v1370_v11, %v1369_v8 }
0x116a   :  { %v1372_v38 = vrot.slane %v1371_v15, 2  ;;  %v1027_v16 = vpop.permute.xlu0 %1026  ;;  %v1367_v18 = vrot.slane %v1366_v3, 1 }
0x116b   :  { %1029 = vst.msk [vmem:[#allocation3] sm:$0x3] %vm112_vm0, %v1027_v16 }
0x116c   :  { %v1373_v19 = vadd.f32 %v1372_v38, %v1371_v15  ;;  %v1368_v23 = vadd.f32 %v1367_v18, %v1366_v3 }
0x116e   :  { %v1374_v20 = vrot.slane %v1373_v19, 1  ;;  %v1383_v22 = vld [vmem:[#allocation2 + $0x2] sm:$0x3] }
0x116f   :  { %2270 = vmatmul.mubr.msk.f32.vlgmr.msra.gmra.mrb[10].mxu1 %vm131_vm2, %v1383_v22  ;;  %v1663_v27 = vld [vmem:[#allocation2 + $0x2] sm:$0x3] }
0x1170   :  { %v1375_v25 = vadd.f32 %v1374_v20, %v1373_v19  ;;  %2385 = vmatpush3.bf16.msra.mxu1 %v2884_v48  ;;  %2291 = vmatprep.mubr.msk.f32.mxu1 %vm2660_vm1, %v2659_v1  ;;  %v1381_v48 = vld [vmem:[#allocation2] sm:$0x3] }
0x1171   :  { %2386 = vmatprep.subr.bf16.mxu1 %v2658_v0 }
0x1172   :  { %v1378_v26 = vsel %vm662_vm3, %v1375_v25, %v1368_v23  ;;  %v1382_v41 = vld [vmem:[#allocation3] sm:$0x3] }
0x1173   :  { %1380 = vst.msk [vmem:[#allocation4] sm:$0x3] %vm112_vm0, %v1378_v26 }
0x1174   :  { %2388 = vmatpush3.bf16.msra.mxu1 %v2889_v55 }
0x1177   :  { %2292 = vmatmul.mubr.msk.f32.vlgmr.msra.gmra.mrb[12].mxu1 %vm131_vm2, %v1663_v27 }
0x117a   :  { %v1388_v28 = vld [vmem:[#allocation4] sm:$0x3] }
0x117b   :  { %2259 = vmatmul.mubr.msk.f32.vlgmr.msra.gmra.mrb[10].mxu0 %vm131_vm2, %v1388_v28 }
0x117c   :  { %2379 = vmatpush3.bf16.msra.mxu0 %v2852_v17  ;;  %2280 = vmatprep.mubr.msk.f32.mxu0 %vm2660_vm1, %v2659_v1 }
0x117d   :  { %2380 = vmatprep.subr.bf16.mxu0 %v2658_v0 }
0x1180   :  { %2382 = vmatpush3.bf16.msra.mxu0 %v2860_v21 }
0x1181   :  { %2389 = vmatprep.subr.bf16.mxu0 %v2658_v0 }
0x1183   :  { %2281 = vmatmul.mubr.msk.f32.vlgmr.msra.gmra.mrb[12].mxu0 %vm131_vm2, %v1381_v48 }
0x1184   :  { %2391 = vmatpush3.bf16.msra.mxu0 %v2886_v52  ;;  %2302 = vmatprep.mubr.msk.f32.mxu0 %vm2660_vm1, %v2659_v1 }
0x1185   :  { %2392 = vmatprep.subr.bf16.mxu0 %v2658_v0 }
0x1188   :  { %2394 = vmatpush3.bf16.msra.mxu0 %v2893_v56 }
0x1242   :  { %v1535_v17 = vpop.f32.mrb[10].mxu1 }
0x1243   :  { %v2271_v55 = vpop.f32.mrb[11].mxu1 }
0x124a   :  { %v1742_v30 = vpop.f32.mrb[12].mxu1 }
0x124b   :  { %v2293_v31 = vpop.f32.mrb[13].mxu1 }
0x124e   :  { %v1462_v33 = vpop.f32.mrb[10].mxu0 }
0x124f   :  { %v1536_v21 = vadd.f32 %v1535_v17, %v1462_v33  ;;  %v2260_v36 = vpop.f32.mrb[11].mxu0 }
0x1256   :  { %v1612_v34 = vpop.f32.mrb[12].mxu0 }
0x1257   :  { %v1616_v37 = vadd.f32 %v1612_v34, %v1536_v21  ;;  %v2282_v39 = vpop.f32.mrb[13].mxu0 }
0x1259   :  { %v1624_v40 = vadd.f32 %v2875_v29, %v1616_v37 }
0x125b   :  { %2462 = vtanh.f32 %v1624_v40  ;;  %v2060_v0 = vmul.f32 -1.442695, %v1624_v40 }
0x125d   :  { %2464 = vpow2.f32 %v2060_v0 }
0x1265   :  { %v2463_v52 = vpop.eup %2462 }
0x1266   :  { %1638 = vrot.lane.b32.xlu0 %v2463_v52, %s2661_s18 }
0x1267   :  { %v2465_v56 = vpop.eup %2464 }
0x1268   :  { %v1628_v43 = vadd.f32 1.0, %v2465_v56 }
0x126a   :  { %1633 = vrot.lane.b32.xlu0 %v1382_v41, %s2662_s9  ;;  %2466 = vrcp.f32 %v1628_v43 }
0x1274   :  { %v2467_v5 = vpop.eup %2466 }
0x12d8   :  { %v1639_v46 = vpop.permute.xlu0 %1638 }
0x12d9   :  { %v1641_v24 = vmul.f32 %v2467_v5, %v1639_v46 }
0x12db   :  { %1643 = vrot.lane.b32.xlu0 %v1641_v24, %s2662_s9 }
0x12dc   :  { %v1634_v47 = vpop.permute.xlu0 %1633 }
0x12dd   :  { %v1636_v49 = vmul.f32 %v2467_v5, %v1634_v47 }
0x134d   :  { %v1644_v29 = vpop.permute.xlu0 %1643 }
0x134e   :  { %v3089_v50 = vadd.f32 %v1644_v29, %v1636_v49 }
0x1350   :  { %2468 = vtanh.f32 %v3089_v50 }
0x135a   :  { %v2469_v51 = vpop.eup %2468 }
0x135b   :  { %1649 = vrot.lane.b32.xlu0 %v2469_v51, %s2661_s18 }
0x13cd   :  { %v1650_v53 = vpop.permute.xlu0 %1649 }
0x13ce   :  { %v1652_v9 = vmul.f32 %v2467_v5, %v1650_v53 }
0x13d0   :  { %1659 = vrot.lane.b32.xlu0 %v1652_v9, %s2662_s9 }
0x1442   :  { %v1660_v12 = vpop.permute.xlu0 %1659 }
0x1443   :  { %1662 = vst.msk [vmem:[#allocation2] sm:$0x3] %vm112_vm0, %v1660_v12  ;;  %2303 = vmatmul.mubr.msk.f32.vlgmr.msra.gmra.mrb[14].mxu0 %vm131_vm2, %v1660_v12 }
0x1516   :  { %v1814_v44 = vpop.f32.mrb[14].mxu0 }
0x1517   :  { %v1815_v57 = vadd.f32 %v1814_v44, %v1742_v30  ;;  %v2304_v58 = vpop.f32.mrb[15].mxu0 }
0x1519   :  { %v1825_v13 = vadd.f32 %v2921_v4, %v1815_v57 }
0x151b   :  { %2470 = vtanh.f32 %v1825_v13  ;;  %v2064_v61 = vmul.f32 -1.442695, %v1825_v13 }
0x151d   :  { %2472 = vpow2.f32 %v2064_v61 }
0x1525   :  { %v2471_v59 = vpop.eup %2470 }
0x1526   :  { %1839 = vrot.lane.b32.xlu0 %v2471_v59, %s2661_s18 }
0x1527   :  { %v2473_v62 = vpop.eup %2472 }
0x1528   :  { %v1829_v63 = vadd.f32 1.0, %v2473_v62 }
0x152a   :  { %1834 = vrot.lane.b32.xlu0 %v1664_v60, %s2662_s9  ;;  %2474 = vrcp.f32 %v1829_v63 }
0x1534   :  { %v2475_v6 = vpop.eup %2474 }
0x1598   :  { %v1840_v7 = vpop.permute.xlu0 %1839 }
0x1599   :  { %v1842_v8 = vmul.f32 %v2475_v6, %v1840_v7 }
0x159b   :  { %1844 = vrot.lane.b32.xlu0 %v1842_v8, %s2662_s9 }
0x159c   :  { %v1835_v10 = vpop.permute.xlu0 %1834 }
0x159d   :  { %v1837_v11 = vmul.f32 %v2475_v6, %v1835_v10 }
0x160d   :  { %v1845_v4 = vpop.permute.xlu0 %1844 }
0x160e   :  { %v3100_v14 = vadd.f32 %v1845_v4, %v1837_v11 }
0x1610   :  { %2476 = vtanh.f32 %v3100_v14 }
0x161a   :  { %v2477_v3 = vpop.eup %2476 }
0x161b   :  { %1850 = vrot.lane.b32.xlu0 %v2477_v3, %s2661_s18 }
0x168d   :  { %v1851_v15 = vpop.permute.xlu0 %1850 }
0x168e   :  { %v1853_v38 = vmul.f32 %v2475_v6, %v1851_v15 }
0x1690   :  { %v1872_v16 = vrot.slane %v1853_v38, %v2930_v32 }
0x1692   :  { %v1873_v18 = vcombine.high %v1872_v16, %v1872_v16  ;;  %v1880_v19 = vrot.slane %v1872_v16, %v2930_v32 }
0x1694   :  { %v1891_v20 = vrot.slane %v1880_v19, %v2932_v35  ;;  %v1887_v22 = vrot.slane %v1873_v18, %v2930_v32 }
0x1696   :  { %1896 = vrot.lane.b32.xlu0 %v1891_v20, %s2662_s9  ;;  %v1895_v23 = vrot.slane %v1887_v22, %v2932_v35 }
0x1698   :  { %1898 = vrot.lane.b32.xlu1 %v1895_v23, %s2662_s9 }
0x1708   :  { %v1897_v25 = vpop.permute.xlu0 %1896 }
0x1709   :  { %v1902_v26 = vmul.f32 %v1897_v25, %v2941_v42 }
0x170a   :  { %v1899_v27 = vpop.permute.xlu1 %1898 }
0x170b   :  { %v1903_v28 = vmul.f32 %v1899_v27, %v2943_v45  ;;  %v1904_v48 = vsel %vm131_vm2, %v1902_v26, 0.0 }
0x170c   :  { %1905 = vadd.xlane.f32.xlu0 %v1904_v48 }
0x170d   :  { %v1907_v17 = vsel %vm131_vm2, %v1903_v28, 0.0 }
0x170e   :  { %1908 = vadd.xlane.f32.xlu1 %v1907_v17 }
0x1799   :  { %v1906_v55 = vpop.xlane.xlu0 %1905 }
0x179a   :  { %v1915_v30 = vrot.slane %v1906_v55, %v2949_v54 }
0x179b   :  { %v1909_v32 = vpop.xlane.xlu1 %1908 }
0x179c   :  { %v1919_v31 = vrot.slane %v1909_v32, %v2949_v54 }
0x179e   :  { %v1920_v33 = vsel %vm662_vm3, %v1919_v31, %v1915_v30 }
0x179f   :  { %v1922_v21 = vsel %vm665_vm4, %v1920_v33, -inf }
0x17a0   :  { %1923 = vmax.xlane.f32.xlu0 %v1922_v21 }
0x182d   :  { %v1924_v36 = vpop.xlane.xlu0 %1923 }
0x182e   :  { %v1929_v34 = vrot.slane %v1924_v36, %v2932_v35  ;;  %v1933_v37 = vrot.slane %v1924_v36, %v2955_v2 }
0x1830   :  { %v1936_v39 = vsub.f32 %v1906_v55, %v1929_v34  ;;  %v1937_v40 = vsub.f32 %v1909_v32, %v1933_v37 }
0x1832   :  { %v1938_v52 = vmul.f32 1.442695, %v1936_v39  ;;  %v1940_v41 = vmul.f32 1.442695, %v1937_v40 }
0x1834   :  { %2478 = vpow2.f32 %v1938_v52 }
0x1835   :  { %2480 = vpow2.f32 %v1940_v41 }
0x183e   :  { %v2479_v0 = vpop.eup %2478 }
0x183f   :  { %v2481_v56 = vpop.eup %2480  ;;  %1945 = vperm.xlu0 %2413, %v2479_v0  }
0x1840   :  { %1948 = vperm.xlu1 %2412, %v2481_v56  }
0x18be   :  { %v1946_v43 = vpop.permute.xlu0 %1945 }
0x18bf   :  { %v1949_v5 = vpop.permute.xlu1 %1948  ;;  %v1953_v46 = vrot.slane %v1946_v43, %v2949_v54 }
0x18c0   :  { %v1957_v24 = vrot.slane %v1949_v5, %v2949_v54 }
0x18c2   :  { %v1958_v47 = vsel %vm662_vm3, %v1957_v24, %v1953_v46 }
0x18c3   :  { %v1960_v49 = vsel %vm665_vm4, %v1958_v47, 0.0 }
0x18c4   :  { %1961 = vadd.xlane.f32.xlu1 %v1960_v49 }
0x1951   :  { %v1962_v29 = vpop.xlane.xlu1 %1961 }
0x1952   :  { %v1967_v51 = vrot.slane %v1962_v29, %v2932_v35  ;;  %v1971_v53 = vrot.slane %v1962_v29, %v2955_v2 }
0x1954   :  { %2482 = vrcp.f32 %v1967_v51 }
0x1955   :  { %2484 = vrcp.f32 %v1971_v53 }
0x195e   :  { %v2483_v9 = vpop.eup %2482 }
0x195f   :  { %v1975_v12 = vmul.f32 %v2483_v9, %v2479_v0  ;;  %v2485_v44 = vpop.eup %2484 }
0x1960   :  { %v1977_v57 = vmul.f32 %v2485_v44, %v2481_v56 }
0x1961   :  { %1980 = vperm.xlu0 %2413, %v1975_v12  }
0x1965   :  { %1985 = vperm.xlu0 %2413, %v1977_v57  }
0x1969   :  { %1860 = vrot.lane.b32.xlu0 %v1853_v38, %s2662_s9 }
0x196d   :  { %1654 = vrot.lane.b32.xlu0 %v3089_v50, %s2665_s7 }
0x19e0   :  { %v1981_v54 = vpop.permute.xlu0 %1980 }
0x19e1   :  { %v1988_v35 = vmul.f32 %v1981_v54, %v2941_v42 }
0x19e3   :  { %v1990_v2 = vsel %vm131_vm2, %v1988_v35, 0.0 }
0x19e4   :  { %v1991_v58 = vrot.slane %v1990_v2, 4  ;;  %v1986_v13 = vpop.permute.xlu0 %1985 }
0x19e5   :  { %v1989_v59 = vmul.f32 %v1986_v13, %v2943_v45 }
0x19e6   :  { %v1992_v60 = vadd.f32 %v1991_v58, %v1990_v2 }
0x19e7   :  { %v1997_v61 = vsel %vm131_vm2, %v1989_v59, 0.0 }
0x19e8   :  { %v1993_v62 = vrot.slane %v1992_v60, 2  ;;  %v1998_v63 = vrot.slane %v1997_v61, 4  ;;  %v1861_v6 = vpop.permute.xlu0 %1860 }
0x19e9   :  { %1863 = vst.msk [vmem:[#allocation2 + $0x2] sm:$0x3] %vm112_vm0, %v1861_v6 }
0x19ea   :  { %v1994_v50 = vadd.f32 %v1993_v62, %v1992_v60  ;;  %v1999_v7 = vadd.f32 %v1998_v63, %v1997_v61 }
0x19ec   :  { %v2000_v1 = vrot.slane %v1999_v7, 2  ;;  %v1655_v8 = vpop.permute.xlu0 %1654  ;;  %v1995_v42 = vrot.slane %v1994_v50, 1 }
0x19ed   :  { %1657 = vst.msk [vmem:[#allocation3] sm:$0x3] %vm112_vm0, %v1655_v8 }
0x19ee   :  { %v2001_v10 = vadd.f32 %v2000_v1, %v1999_v7  ;;  %v1996_v45 = vadd.f32 %v1995_v42, %v1994_v50 }
0x19f0   :  { %v2002_v11 = vrot.slane %v2001_v10, 1  ;;  %v2011_v4 = vld [vmem:[#allocation2 + $0x2] sm:$0x3] }
0x19f1   :  { %2012 = vst.msk [vmem:[#allocation16] sm:$0x3] %vm112_vm0, %v2011_v4 }
0x19f2   :  { %v2003_v3 = vadd.f32 %v2002_v11, %v2001_v10 }
0x19f4   :  { %v2006_v15 = vsel %vm662_vm3, %v2003_v3, %v1996_v45 }
0x19f5   :  { %2008 = vst.msk [vmem:[#allocation4] sm:$0x3] %vm112_vm0, %v2006_v15 }
0x19fc   :  { %v2013_v38 = vld [vmem:[#allocation4] sm:$0x3] }
0x19fd   :  { %2015 = vrot.lane.b32.xlu0 %v2013_v38, %s2662_s9 }
0x1a01   :  { %1855 = vrot.lane.b32.xlu0 %v3100_v14, %s2665_s7 }
0x1a6f   :  { %v2016_v16 = vpop.permute.xlu0 %2015 }
0x1a70   :  { %2019 = vst.msk [vmem:[#allocation16] sm:$0x3] %vm2018_vm6, %v2016_v16 }
0x1a71   :  { %2629 = shalt.err (!%p2626_p10)
}
0x1a72   :  { %s2630_s19 = scalar_lea.hbm %s3164_s8, 32 }
0x1a73   :  { %p2631_p11 = scmp.ne.s32.totalorder %s3164_s8, %s2630_s19  ;;  %p2634_p12 = scmp.lt.u32.totalorder %s2630_s19, %s3164_s8 }
0x1a75   :  { %p2636_p13 = pnand %p2634_p12, %p2631_p11 }
0x1a77   :  { %2639 = shalt.err (!%p2636_p13)
}
0x1a78   :  { %2029 = dma.vmem_to_hbm [thread:$0]  %s2027_s13, 32, %s3164_s8, [#allocation7]   ;;  %v1856_v14 = vpop.permute.xlu0 %1855 }
0x1a79   :  { %1858 = vst.msk [vmem:[#allocation3 + $0x2] sm:$0x3] %vm112_vm0, %v1856_v14 }
0x1a7a   :  { %2648 = dma.done.wait [#allocation7], 32  }
0x1a7b   :  { %2649 = vsyncadd [#allocation7], 4294967264 }
0x1a7c   :  { %2033 = vsyncpa [#allocation6], 1 }
0x1a7d   :  { %2034 = vsyncpa [#allocation9], 1 }
0x1a7e   :  { %2035 = vsyncpa [#allocation12], 1 }
0x1a7f   :  { %2036 = vsyncpa [#allocation15], 1 }
0x1a80   :  { %2037 = vsyncpa [#allocation7], 1 }

</bundles_post_ra>
